<compile_context>
chip_gen: v6e
topology: v6e:2x2x1
jax: 0.10.0
libtpu: 0.0.40
codegen_flags: <defaults>
</compile_context>

<pallas_src>
import functools

import numpy as np
import jax
import jax.numpy as jnp
from jax import lax
from jax.experimental import pallas as pl
from jax.experimental.pallas import tpu as pltpu

_EPS = 1e-5


# -----------------------------------------------------------------------------
# Pallas kernel: one grid step = (batch element, strip of TH output rows).
#   conv1(1x1)+bias+ReLU -> conv2(3x3,pad1,stride)+bias+ReLU
#   -> conv3(1x1)+bias (+ shortcut) -> ReLU
# BN scales are pre-folded into the weights; only biases are applied here.
# -----------------------------------------------------------------------------
def _bottleneck_kernel(*refs, H, W, Wo, TH, stride, has_proj):
    if has_proj:
        (x_ref, w1_ref, b1_ref, w2_ref, b2_ref, w3_ref, b3_ref,
         ws_ref, bs_ref, o_ref) = refs
    else:
        (x_ref, w1_ref, b1_ref, w2_ref, b2_ref, w3_ref, b3_ref, o_ref) = refs
        ws_ref = bs_ref = None

    cdt = w1_ref.dtype                      # compute dtype for MXU operands
    Cin = x_ref.shape[-1]
    Cmid = w1_ref.shape[-1]
    Cout = w3_ref.shape[-1]
    Wp = W + 2                              # padded width of x / of conv1 out
    TH_in = (TH - 1) * stride + 3           # padded-h rows needed per strip

    t = pl.program_id(1)
    row0 = t * (TH * stride)                # first padded row of this strip

    # Input rows for this strip (halo included); x is zero-padded by 1 in H,W.
    x_blk = x_ref[0, pl.ds(row0, TH_in), :, :]            # (TH_in, Wp, Cin)

    # ---- conv1: 1x1 conv (BN scale folded) + bias + ReLU --------------------
    h = jnp.dot(x_blk.reshape(TH_in * Wp, Cin), w1_ref[...],
                preferred_element_type=jnp.float32)       # (TH_in*Wp, Cmid)
    h = jnp.maximum(h + b1_ref[...], 0.0).reshape(TH_in, Wp, Cmid)

    # conv2's zero padding acts on h (the conv1 output), so zero the positions
    # that correspond to the spatial pad of x (they held relu(b1), not 0).
    gr = row0 + lax.broadcasted_iota(jnp.int32, (TH_in, Wp, 1), 0)
    gc = lax.broadcasted_iota(jnp.int32, (TH_in, Wp, 1), 1)
    valid = (gr >= 1) & (gr <= H) & (gc >= 1) & (gc <= W)
    h = jnp.where(valid, h, 0.0).astype(cdt)              # (TH_in, Wp, Cmid)

    # ---- conv2: 3x3, pad=1, stride; 3 matmuls with K = 3*Cmid ---------------
    acc = None
    for dy in range(3):
        rows = lax.slice(h, (dy, 0, 0),
                         (dy + (TH - 1) * stride + 1, Wp, Cmid),
                         (stride, 1, 1))                  # (TH, Wp, Cmid)
        taps = [lax.slice(rows, (0, dx, 0),
                          (TH, dx + (Wo - 1) * stride + 1, Cmid),
                          (1, stride, 1)) for dx in range(3)]
        lhs = jnp.concatenate(taps, axis=-1).reshape(TH * Wo, 3 * Cmid)
        part = jnp.dot(lhs, w2_ref[dy], preferred_element_type=jnp.float32)
        acc = part if acc is None else acc + part
    h2 = jnp.maximum(acc + b2_ref[...], 0.0)              # (TH*Wo, Cmid) f32

    # ---- conv3: 1x1 conv + bias ---------------------------------------------
    h3 = jnp.dot(h2.astype(cdt), w3_ref[...],
                 preferred_element_type=jnp.float32) + b3_ref[...]

    # ---- shortcut -----------------------------------------------------------
    # Reuse the already-loaded x block; output (r, c) maps to padded x
    # (r*stride + 1, c*stride + 1), i.e. strip-local (i*stride + 1, ...).
    xs = lax.slice(x_blk, (1, 1, 0),
                   (1 + (TH - 1) * stride + 1, 1 + (Wo - 1) * stride + 1, Cin),
                   (stride, stride, 1))                   # (TH, Wo, Cin)
    if has_proj:
        sc = jnp.dot(xs.reshape(TH * Wo, Cin), ws_ref[...],
                     preferred_element_type=jnp.float32) + bs_ref[...]
    else:
        # identity shortcut (stride==1, Cin==Cout): no matmul, just add x.
        sc = xs.reshape(TH * Wo, Cout).astype(jnp.float32)

    out = jnp.maximum(h3 + sc, 0.0)
    o_ref[...] = out.reshape(1, TH, Wo, Cout).astype(o_ref.dtype)


# -----------------------------------------------------------------------------
# Wrappers
# -----------------------------------------------------------------------------
def _nbytes(shape, dtype):
    return int(np.prod(shape)) * jnp.dtype(dtype).itemsize


def bottleneck_forward_nhwc(x_nhwc, kparams, stride=1, *, block_rows=8):
    """Native NHWC entry point (preferred: no layout transposes)."""
    N, H, W, Cin = x_nhwc.shape
    w1 = kparams["w1"]
    Cmid = w1.shape[1]
    Cout = kparams["w3"].shape[1]
    has_proj = "ws" in kparams
    if not has_proj:
        assert stride == 1 and Cin == Cout, "identity shortcut shape mismatch"

    Ho = (H + 2 - 3) // stride + 1
    Wo = (W + 2 - 3) // stride + 1
    Wp = W + 2

    # Output-row strip size: largest divisor of Ho that is <= block_rows.
    TH = max(d for d in range(1, min(block_rows, Ho) + 1) if Ho % d == 0)
    nt = Ho // TH
    TH_in = (TH - 1) * stride + 3

    cdt = w1.dtype
    # Zero-pad spatially by 1 (3x3 halo) and cast to the compute dtype once.
    x_pad = jnp.pad(x_nhwc, ((0, 0), (1, 1), (1, 1), (0, 0))).astype(cdt)

    kernel = functools.partial(_bottleneck_kernel, H=H, W=W, Wo=Wo, TH=TH,
                               stride=stride, has_proj=has_proj)

    def wspec(arr):
        zeros = (0,) * arr.ndim
        return pl.BlockSpec(arr.shape, lambda n, t, _z=zeros: _z)

    ins = [x_pad, kparams["w1"], kparams["b1"], kparams["w2"], kparams["b2"],
           kparams["w3"], kparams["b3"]]
    in_specs = [pl.BlockSpec((1, H + 2, Wp, Cin), lambda n, t: (n, 0, 0, 0))]
    in_specs += [wspec(a) for a in ins[1:]]
    if has_proj:
        ins += [kparams["ws"], kparams["bs"]]
        in_specs += [wspec(kparams["ws"]), wspec(kparams["bs"])]

    out_dtype = x_nhwc.dtype

    # Explicit VMEM budget: double-buffered input/output blocks + weights +
    # headroom for per-strip intermediates and compiler scratch.
    est = (2 * _nbytes((1, H + 2, Wp, Cin), cdt)
           + 2 * _nbytes((1, TH, Wo, Cout), out_dtype)
           + sum(_nbytes(a.shape, a.dtype) for a in ins[1:])
           + 8 * _nbytes((TH_in, Wp, Cmid), jnp.float32)
           + 8 * _nbytes((TH * Wo, max(3 * Cmid, Cout)), jnp.float32))
    vmem_limit = int(min(max(est, 32 * 1024 * 1024), 48 * 1024 * 1024))

    out = pl.pallas_call(
        kernel,
        out_shape=jax.ShapeDtypeStruct((N, Ho, Wo, Cout), out_dtype),
        grid=(N, nt),
        in_specs=in_specs,
        out_specs=pl.BlockSpec((1, TH, Wo, Cout), lambda n, t: (n, t, 0, 0)),
        compiler_params=pltpu.CompilerParams(
            dimension_semantics=("parallel", "parallel"),
            vmem_limit_bytes=vmem_limit),
    )(*ins)
    return out


def bottleneck_forward_nchw(x_nchw, kparams, stride=1, **kw):
    # Kept only for parity with the PyTorch (NCHW) module; prefer calling
    # bottleneck_forward_nhwc directly (the transposes are extra HBM passes).
    x = jnp.transpose(x_nchw, (0, 2, 3, 1))
    y = bottleneck_forward_nhwc(x, kparams, stride=stride, **kw)
    return jnp.transpose(y, (0, 3, 1, 2))


# -----------------------------------------------------------------------------
# Deterministic parameter construction (PyTorch layouts), BN folding, reference
# -----------------------------------------------------------------------------
def _fold_bn(gamma, beta, mean, var):
    scale = gamma / jnp.sqrt(var + _EPS)
    bias = beta - mean * scale
    return scale.reshape(1, -1), bias.reshape(1, -1)


def make_raw_params(key, in_c, mid_c, stride):
    out_c = 4 * mid_c
    ks = jax.random.split(key, 20)

    def bn_params(k, c):
        k1, k2, k3, k4 = jax.random.split(k, 4)
        gamma = jax.random.uniform(k1, (c,), jnp.float32, 0.5, 1.5)
        beta = jax.random.normal(k2, (c,), jnp.float32) * 0.1
        mean = jax.random.normal(k3, (c,), jnp.float32) * 0.1
        var = jax.random.uniform(k4, (c,), jnp.float32, 0.5, 1.5)
        return gamma, beta, mean, var

    raw = {
        "w1": jax.random.normal(ks[0], (mid_c, in_c, 1, 1), jnp.float32) * 0.2,
        "bn1": bn_params(ks[1], mid_c),
        "w2": jax.random.normal(ks[2], (mid_c, mid_c, 3, 3), jnp.float32) * 0.1,
        "bn2": bn_params(ks[3], mid_c),
        "w3": jax.random.normal(ks[4], (out_c, mid_c, 1, 1), jnp.float32) * 0.2,
        "bn3": bn_params(ks[5], out_c),
        "has_shortcut": (stride != 1 or in_c != out_c),
    }
    if raw["has_shortcut"]:
        raw["ws"] = jax.random.normal(ks[6], (out_c, in_c, 1, 1), jnp.float32) * 0.2
        raw["bns"] = bn_params(ks[7], out_c)
    return raw


def raw_to_kernel_params(raw, in_c, mid_c, compute_dtype=jnp.bfloat16):
    """Fold eval-mode BN scale into the conv weights; pack conv2 for K=3*Cmid."""
    out_c = 4 * mid_c
    s1, b1 = _fold_bn(*raw["bn1"])
    s2, b2 = _fold_bn(*raw["bn2"])
    s3, b3 = _fold_bn(*raw["bn3"])

    w1 = raw["w1"].reshape(mid_c, in_c).T * s1                   # (in, mid)
    w2 = jnp.transpose(raw["w2"], (2, 3, 1, 0))                  # (kh,kw,in,out)
    w2 = w2.reshape(3, 3 * mid_c, mid_c) * s2.reshape(1, 1, mid_c)
    w3 = raw["w3"].reshape(out_c, mid_c).T * s3                  # (mid, out)

    params = dict(w1=w1.astype(compute_dtype), b1=b1,
                  w2=w2.astype(compute_dtype), b2=b2,
                  w3=w3.astype(compute_dtype), b3=b3)
    if raw["has_shortcut"]:
        ss, bs = _fold_bn(*raw["bns"])
        ws = raw["ws"].reshape(out_c, in_c).T * ss               # (in, out)
        params["ws"] = ws.astype(compute_dtype)
        params["bs"] = bs
    return params


def reference_forward(x, raw, stride):
    """Pure-JAX NCHW reference matching the PyTorch module (eval-mode BN)."""
    def conv(y, w, s=1, p=0):
        return lax.conv_general_dilated(
            y, w, (s, s), [(p, p), (p, p)],
            dimension_numbers=("NCHW", "OIHW", "NCHW"))

    def bn(y, params):
        g, b, m, v = params
        g, b, m, v = (t[None, :, None, None] for t in (g, b, m, v))
        return (y - m) / jnp.sqrt(v + _EPS) * g + b

    out = jax.nn.relu(bn(conv(x, raw["w1"]), raw["bn1"]))
    out = jax.nn.relu(bn(conv(out, raw["w2"], s=stride, p=1), raw["bn2"]))
    out = bn(conv(out, raw["w3"]), raw["bn3"])
    if raw["has_shortcut"]:
        sc = bn(conv(x, raw["ws"], s=stride), raw["bns"])
    else:
        sc = x
    return jax.nn.relu(out + sc)


if __name__ == "__main__":
    key = jax.random.PRNGKey(0)

    # NOTE: these are tiny correctness shapes (channels << 128 lanes); real
    # ResNet channel counts are what the kernel's matmul/store layout targets.
    N, Hs, Ws_ = 2, 16, 16
    configs = [
        # (name, in_c, mid_c, stride, compute_dtype, rtol, atol)
        ("projection shortcut / f32", 4, 4, 1, jnp.float32, 1e-4, 1e-4),
        ("identity shortcut / bf16", 16, 4, 1, jnp.bfloat16, 1e-1, 1e-1),
    ]

    for i, (name, in_c, mid_c, stride, cdt, rtol, atol) in enumerate(configs):
        k_x, k_p = jax.random.split(jax.random.fold_in(key, i))
        x_nchw = jax.random.normal(k_x, (N, in_c, Hs, Ws_), jnp.float32)

        raw = make_raw_params(k_p, in_c, mid_c, stride)
        kparams = raw_to_kernel_params(raw, in_c, mid_c, compute_dtype=cdt)

        y = jax.block_until_ready(
            bottleneck_forward_nchw(x_nchw, kparams, stride=stride))
        y_ref = jax.block_until_ready(reference_forward(x_nchw, raw, stride))
        np.testing.assert_allclose(np.asarray(y), np.asarray(y_ref),
                                   rtol=rtol, atol=atol, err_msg=name)

    print("KERNEL_OK")
</pallas_src>

<mosaic_0001>
module attributes {stable_mosaic.version = 11 : i64} {
  func.func @_bottleneck_kernel(%arg0: i32, %arg1: i32, %arg2: memref<1x18x18x4xf32, #tpu.memory_space<vmem>>, %arg3: memref<4x4xf32, #tpu.memory_space<vmem>>, %arg4: memref<1x4xf32, #tpu.memory_space<vmem>>, %arg5: memref<3x12x4xf32, #tpu.memory_space<vmem>>, %arg6: memref<1x4xf32, #tpu.memory_space<vmem>>, %arg7: memref<4x16xf32, #tpu.memory_space<vmem>>, %arg8: memref<1x16xf32, #tpu.memory_space<vmem>>, %arg9: memref<4x16xf32, #tpu.memory_space<vmem>>, %arg10: memref<1x16xf32, #tpu.memory_space<vmem>>, %arg11: memref<1x8x16x16xf32, #tpu.memory_space<vmem>>) attributes {dimension_semantics = [#tpu.dimension_semantics<parallel>, #tpu.dimension_semantics<parallel>], iteration_bounds = array<i64: 2, 2>, scalar_prefetch = 0 : i64, scratch_operands = 0 : i64, tpu.core_type = #tpu.core_type<tc>, window_params = [{transform_indices = @transform_0, window_bounds = array<i64: 1, 18, 18, 4>}, {pipeline_mode = #tpu.pipeline_mode<synchronous>, transform_indices = @transform_1, window_bounds = array<i64: 4, 4>}, {pipeline_mode = #tpu.pipeline_mode<synchronous>, transform_indices = @transform_2, window_bounds = array<i64: 1, 4>}, {pipeline_mode = #tpu.pipeline_mode<synchronous>, transform_indices = @transform_3, window_bounds = array<i64: 3, 12, 4>}, {pipeline_mode = #tpu.pipeline_mode<synchronous>, transform_indices = @transform_4, window_bounds = array<i64: 1, 4>}, {pipeline_mode = #tpu.pipeline_mode<synchronous>, transform_indices = @transform_5, window_bounds = array<i64: 4, 16>}, {pipeline_mode = #tpu.pipeline_mode<synchronous>, transform_indices = @transform_6, window_bounds = array<i64: 1, 16>}, {pipeline_mode = #tpu.pipeline_mode<synchronous>, transform_indices = @transform_7, window_bounds = array<i64: 4, 16>}, {pipeline_mode = #tpu.pipeline_mode<synchronous>, transform_indices = @transform_8, window_bounds = array<i64: 1, 16>}, {transform_indices = @transform_9, window_bounds = array<i64: 1, 8, 16, 16>}]} {
    %c8_i32 = arith.constant 8 : i32
    %0 = arith.muli %arg1, %c8_i32 : i32
    %c0 = arith.constant 0 : index
    %1 = arith.index_cast %0 : i32 to index
    %c0_0 = arith.constant 0 : index
    %c0_1 = arith.constant 0 : index
    %2 = vector.load %arg2[%c0, %1, %c0_0, %c0_1] : memref<1x18x18x4xf32, #tpu.memory_space<vmem>>, vector<1x10x18x4xf32>
    %3 = vector.shape_cast %2 : vector<1x10x18x4xf32> to vector<10x18x4xf32>
    %4 = vector.shape_cast %3 : vector<10x18x4xf32> to vector<180x4xf32>
    %c0_2 = arith.constant 0 : index
    %c0_3 = arith.constant 0 : index
    %5 = vector.load %arg3[%c0_2, %c0_3] : memref<4x4xf32, #tpu.memory_space<vmem>>, vector<4x4xf32>
    %cst = arith.constant dense<0.000000e+00> : vector<180x4xf32>
    %6 = tpu.matmul %4, %5, %cst {dimension_numbers = #tpu.dot_dimension_numbers<[1], [0], [0], [1], [0, 0, 1, 1], [], []>} : vector<180x4xf32>, vector<4x4xf32>, vector<180x4xf32> -> vector<180x4xf32>
    %c0_4 = arith.constant 0 : index
    %c0_5 = arith.constant 0 : index
    %7 = vector.load %arg4[%c0_4, %c0_5] : memref<1x4xf32, #tpu.memory_space<vmem>>, vector<1x4xf32>
    %8 = vector.broadcast %7 : vector<1x4xf32> to vector<180x4xf32>
    %9 = arith.addf %6, %8 : vector<180x4xf32>
    %cst_6 = arith.constant 0.000000e+00 : f32
    %10 = vector.broadcast %cst_6 : f32 to vector<180x4xf32>
    %11 = arith.maximumf %9, %10 : vector<180x4xf32>
    %12 = vector.shape_cast %11 : vector<180x4xf32> to vector<10x18x4xf32>
    %13 = tpu.iota {dimensions = array<i32: 0>} : vector<10x18x1xi32>
    %14 = vector.broadcast %0 : i32 to vector<10x18x1xi32>
    %15 = arith.addi %14, %13 : vector<10x18x1xi32>
    %16 = tpu.iota {dimensions = array<i32: 1>} : vector<10x18x1xi32>
    %c1_i32 = arith.constant 1 : i32
    %17 = vector.broadcast %c1_i32 : i32 to vector<10x18x1xi32>
    %18 = arith.cmpi sge, %15, %17 : vector<10x18x1xi32>
    %c16_i32 = arith.constant 16 : i32
    %19 = vector.broadcast %c16_i32 : i32 to vector<10x18x1xi32>
    %20 = arith.cmpi sle, %15, %19 : vector<10x18x1xi32>
    %21 = arith.andi %18, %20 : vector<10x18x1xi1>
    %c1_i32_7 = arith.constant 1 : i32
    %22 = vector.broadcast %c1_i32_7 : i32 to vector<10x18x1xi32>
    %23 = arith.cmpi sge, %16, %22 : vector<10x18x1xi32>
    %24 = arith.andi %21, %23 : vector<10x18x1xi1>
    %c16_i32_8 = arith.constant 16 : i32
    %25 = vector.broadcast %c16_i32_8 : i32 to vector<10x18x1xi32>
    %26 = arith.cmpi sle, %16, %25 : vector<10x18x1xi32>
    %27 = arith.andi %24, %26 : vector<10x18x1xi1>
    %cst_9 = arith.constant 0.000000e+00 : f32
    %28 = vector.shape_cast %27 : vector<10x18x1xi1> to vector<10x18x1xi1>
    %29 = vector.broadcast %28 : vector<10x18x1xi1> to vector<10x18x4xi1>
    %30 = vector.broadcast %cst_9 : f32 to vector<10x18x4xf32>
    %31 = arith.select %29, %12, %30 : vector<10x18x4xi1>, vector<10x18x4xf32>
    %32 = vector.extract_strided_slice %31 {offsets = [0, 0, 0], sizes = [8, 18, 4], strides = [1, 1, 1]} : vector<10x18x4xf32> to vector<8x18x4xf32>
    %33 = vector.extract_strided_slice %32 {offsets = [0, 0, 0], sizes = [8, 16, 4], strides = [1, 1, 1]} : vector<8x18x4xf32> to vector<8x16x4xf32>
    %34 = vector.extract_strided_slice %32 {offsets = [0, 1, 0], sizes = [8, 16, 4], strides = [1, 1, 1]} : vector<8x18x4xf32> to vector<8x16x4xf32>
    %35 = vector.extract_strided_slice %32 {offsets = [0, 2, 0], sizes = [8, 16, 4], strides = [1, 1, 1]} : vector<8x18x4xf32> to vector<8x16x4xf32>
    %36 = tpu.concatenate %33, %34, %35 in 2 : vector<8x16x4xf32>, vector<8x16x4xf32>, vector<8x16x4xf32> -> vector<8x16x12xf32>
    %37 = vector.shape_cast %36 : vector<8x16x12xf32> to vector<128x12xf32>
    %c0_10 = arith.constant 0 : index
    %c0_11 = arith.constant 0 : index
    %c0_12 = arith.constant 0 : index
    %38 = vector.load %arg5[%c0_10, %c0_11, %c0_12] : memref<3x12x4xf32, #tpu.memory_space<vmem>>, vector<1x12x4xf32>
    %39 = vector.shape_cast %38 : vector<1x12x4xf32> to vector<12x4xf32>
    %cst_13 = arith.constant dense<0.000000e+00> : vector<128x4xf32>
    %40 = tpu.matmul %37, %39, %cst_13 {dimension_numbers = #tpu.dot_dimension_numbers<[1], [0], [0], [1], [0, 0, 1, 1], [], []>} : vector<128x12xf32>, vector<12x4xf32>, vector<128x4xf32> -> vector<128x4xf32>
    %41 = vector.extract_strided_slice %31 {offsets = [1, 0, 0], sizes = [8, 18, 4], strides = [1, 1, 1]} : vector<10x18x4xf32> to vector<8x18x4xf32>
    %42 = vector.extract_strided_slice %41 {offsets = [0, 0, 0], sizes = [8, 16, 4], strides = [1, 1, 1]} : vector<8x18x4xf32> to vector<8x16x4xf32>
    %43 = vector.extract_strided_slice %41 {offsets = [0, 1, 0], sizes = [8, 16, 4], strides = [1, 1, 1]} : vector<8x18x4xf32> to vector<8x16x4xf32>
    %44 = vector.extract_strided_slice %41 {offsets = [0, 2, 0], sizes = [8, 16, 4], strides = [1, 1, 1]} : vector<8x18x4xf32> to vector<8x16x4xf32>
    %45 = tpu.concatenate %42, %43, %44 in 2 : vector<8x16x4xf32>, vector<8x16x4xf32>, vector<8x16x4xf32> -> vector<8x16x12xf32>
    %46 = vector.shape_cast %45 : vector<8x16x12xf32> to vector<128x12xf32>
    %c1 = arith.constant 1 : index
    %c0_14 = arith.constant 0 : index
    %c0_15 = arith.constant 0 : index
    %47 = vector.load %arg5[%c1, %c0_14, %c0_15] : memref<3x12x4xf32, #tpu.memory_space<vmem>>, vector<1x12x4xf32>
    %48 = vector.shape_cast %47 : vector<1x12x4xf32> to vector<12x4xf32>
    %cst_16 = arith.constant dense<0.000000e+00> : vector<128x4xf32>
    %49 = tpu.matmul %46, %48, %cst_16 {dimension_numbers = #tpu.dot_dimension_numbers<[1], [0], [0], [1], [0, 0, 1, 1], [], []>} : vector<128x12xf32>, vector<12x4xf32>, vector<128x4xf32> -> vector<128x4xf32>
    %50 = arith.addf %40, %49 : vector<128x4xf32>
    %51 = vector.extract_strided_slice %31 {offsets = [2, 0, 0], sizes = [8, 18, 4], strides = [1, 1, 1]} : vector<10x18x4xf32> to vector<8x18x4xf32>
    %52 = vector.extract_strided_slice %51 {offsets = [0, 0, 0], sizes = [8, 16, 4], strides = [1, 1, 1]} : vector<8x18x4xf32> to vector<8x16x4xf32>
    %53 = vector.extract_strided_slice %51 {offsets = [0, 1, 0], sizes = [8, 16, 4], strides = [1, 1, 1]} : vector<8x18x4xf32> to vector<8x16x4xf32>
    %54 = vector.extract_strided_slice %51 {offsets = [0, 2, 0], sizes = [8, 16, 4], strides = [1, 1, 1]} : vector<8x18x4xf32> to vector<8x16x4xf32>
    %55 = tpu.concatenate %52, %53, %54 in 2 : vector<8x16x4xf32>, vector<8x16x4xf32>, vector<8x16x4xf32> -> vector<8x16x12xf32>
    %56 = vector.shape_cast %55 : vector<8x16x12xf32> to vector<128x12xf32>
    %c2 = arith.constant 2 : index
    %c0_17 = arith.constant 0 : index
    %c0_18 = arith.constant 0 : index
    %57 = vector.load %arg5[%c2, %c0_17, %c0_18] : memref<3x12x4xf32, #tpu.memory_space<vmem>>, vector<1x12x4xf32>
    %58 = vector.shape_cast %57 : vector<1x12x4xf32> to vector<12x4xf32>
    %cst_19 = arith.constant dense<0.000000e+00> : vector<128x4xf32>
    %59 = tpu.matmul %56, %58, %cst_19 {dimension_numbers = #tpu.dot_dimension_numbers<[1], [0], [0], [1], [0, 0, 1, 1], [], []>} : vector<128x12xf32>, vector<12x4xf32>, vector<128x4xf32> -> vector<128x4xf32>
    %60 = arith.addf %50, %59 : vector<128x4xf32>
    %c0_20 = arith.constant 0 : index
    %c0_21 = arith.constant 0 : index
    %61 = vector.load %arg6[%c0_20, %c0_21] : memref<1x4xf32, #tpu.memory_space<vmem>>, vector<1x4xf32>
    %62 = vector.broadcast %61 : vector<1x4xf32> to vector<128x4xf32>
    %63 = arith.addf %60, %62 : vector<128x4xf32>
    %cst_22 = arith.constant 0.000000e+00 : f32
    %64 = vector.broadcast %cst_22 : f32 to vector<128x4xf32>
    %65 = arith.maximumf %63, %64 : vector<128x4xf32>
    %c0_23 = arith.constant 0 : index
    %c0_24 = arith.constant 0 : index
    %66 = vector.load %arg7[%c0_23, %c0_24] : memref<4x16xf32, #tpu.memory_space<vmem>>, vector<4x16xf32>
    %cst_25 = arith.constant dense<0.000000e+00> : vector<128x16xf32>
    %67 = tpu.matmul %65, %66, %cst_25 {dimension_numbers = #tpu.dot_dimension_numbers<[1], [0], [0], [1], [0, 0, 1, 1], [], []>} : vector<128x4xf32>, vector<4x16xf32>, vector<128x16xf32> -> vector<128x16xf32>
    %c0_26 = arith.constant 0 : index
    %c0_27 = arith.constant 0 : index
    %68 = vector.load %arg8[%c0_26, %c0_27] : memref<1x16xf32, #tpu.memory_space<vmem>>, vector<1x16xf32>
    %69 = vector.broadcast %68 : vector<1x16xf32> to vector<128x16xf32>
    %70 = arith.addf %67, %69 : vector<128x16xf32>
    %71 = vector.extract_strided_slice %3 {offsets = [1, 1, 0], sizes = [8, 16, 4], strides = [1, 1, 1]} : vector<10x18x4xf32> to vector<8x16x4xf32>
    %72 = vector.shape_cast %71 : vector<8x16x4xf32> to vector<128x4xf32>
    %c0_28 = arith.constant 0 : index
    %c0_29 = arith.constant 0 : index
    %73 = vector.load %arg9[%c0_28, %c0_29] : memref<4x16xf32, #tpu.memory_space<vmem>>, vector<4x16xf32>
    %cst_30 = arith.constant dense<0.000000e+00> : vector<128x16xf32>
    %74 = tpu.matmul %72, %73, %cst_30 {dimension_numbers = #tpu.dot_dimension_numbers<[1], [0], [0], [1], [0, 0, 1, 1], [], []>} : vector<128x4xf32>, vector<4x16xf32>, vector<128x16xf32> -> vector<128x16xf32>
    %c0_31 = arith.constant 0 : index
    %c0_32 = arith.constant 0 : index
    %75 = vector.load %arg10[%c0_31, %c0_32] : memref<1x16xf32, #tpu.memory_space<vmem>>, vector<1x16xf32>
    %76 = vector.broadcast %75 : vector<1x16xf32> to vector<128x16xf32>
    %77 = arith.addf %74, %76 : vector<128x16xf32>
    %78 = arith.addf %70, %77 : vector<128x16xf32>
    %cst_33 = arith.constant 0.000000e+00 : f32
    %79 = vector.broadcast %cst_33 : f32 to vector<128x16xf32>
    %80 = arith.maximumf %78, %79 : vector<128x16xf32>
    %81 = vector.shape_cast %80 : vector<128x16xf32> to vector<1x8x16x16xf32>
    %c0_34 = arith.constant 0 : index
    %c0_35 = arith.constant 0 : index
    %c0_36 = arith.constant 0 : index
    %c0_37 = arith.constant 0 : index
    %82 = vector.load %arg11[%c0_34, %c0_35, %c0_36, %c0_37] : memref<1x8x16x16xf32, #tpu.memory_space<vmem>>, vector<1x8x16x16xf32>
    tpu.vector_store %arg11[%c0_34, %c0_35, %c0_36, %c0_37], %81 {strides = array<i32>} : memref<1x8x16x16xf32, #tpu.memory_space<vmem>>, vector<1x8x16x16xf32>,
    return
  }
  func.func @transform_0(%arg0: i32, %arg1: i32) -> (i32, i32, i32, i32) {
    %c0_i32 = arith.constant 0 : i32
    %c0_i32_0 = arith.constant 0 : i32
    %c0_i32_1 = arith.constant 0 : i32
    %c0_i32_2 = arith.constant 0 : i32
    return %arg0, %c0_i32, %c0_i32_0, %c0_i32_1 : i32, i32, i32, i32
  }
  func.func @transform_1(%arg0: i32, %arg1: i32) -> (i32, i32) {
    %c0_i32 = arith.constant 0 : i32
    %c0_i32_0 = arith.constant 0 : i32
    %c0_i32_1 = arith.constant 0 : i32
    return %c0_i32, %c0_i32_0 : i32, i32
  }
  func.func @transform_2(%arg0: i32, %arg1: i32) -> (i32, i32) {
    %c0_i32 = arith.constant 0 : i32
    %c0_i32_0 = arith.constant 0 : i32
    %c0_i32_1 = arith.constant 0 : i32
    return %c0_i32, %c0_i32_0 : i32, i32
  }
  func.func @transform_3(%arg0: i32, %arg1: i32) -> (i32, i32, i32) {
    %c0_i32 = arith.constant 0 : i32
    %c0_i32_0 = arith.constant 0 : i32
    %c0_i32_1 = arith.constant 0 : i32
    %c0_i32_2 = arith.constant 0 : i32
    return %c0_i32, %c0_i32_0, %c0_i32_1 : i32, i32, i32
  }
  func.func @transform_4(%arg0: i32, %arg1: i32) -> (i32, i32) {
    %c0_i32 = arith.constant 0 : i32
    %c0_i32_0 = arith.constant 0 : i32
    %c0_i32_1 = arith.constant 0 : i32
    return %c0_i32, %c0_i32_0 : i32, i32
  }
  func.func @transform_5(%arg0: i32, %arg1: i32) -> (i32, i32) {
    %c0_i32 = arith.constant 0 : i32
    %c0_i32_0 = arith.constant 0 : i32
    %c0_i32_1 = arith.constant 0 : i32
    return %c0_i32, %c0_i32_0 : i32, i32
  }
  func.func @transform_6(%arg0: i32, %arg1: i32) -> (i32, i32) {
    %c0_i32 = arith.constant 0 : i32
    %c0_i32_0 = arith.constant 0 : i32
    %c0_i32_1 = arith.constant 0 : i32
    return %c0_i32, %c0_i32_0 : i32, i32
  }
  func.func @transform_7(%arg0: i32, %arg1: i32) -> (i32, i32) {
    %c0_i32 = arith.constant 0 : i32
    %c0_i32_0 = arith.constant 0 : i32
    %c0_i32_1 = arith.constant 0 : i32
    return %c0_i32, %c0_i32_0 : i32, i32
  }
  func.func @transform_8(%arg0: i32, %arg1: i32) -> (i32, i32) {
    %c0_i32 = arith.constant 0 : i32
    %c0_i32_0 = arith.constant 0 : i32
    %c0_i32_1 = arith.constant 0 : i32
    return %c0_i32, %c0_i32_0 : i32, i32
  }
  func.func @transform_9(%arg0: i32, %arg1: i32) -> (i32, i32, i32, i32) {
    %c0_i32 = arith.constant 0 : i32
    %c0_i32_0 = arith.constant 0 : i32
    %c0_i32_1 = arith.constant 0 : i32
    return %arg0, %arg1, %c0_i32, %c0_i32_0 : i32, i32, i32, i32
  }
}

</mosaic_0001>

<bundles_post_ra>
// kernel: tpu_custom_call.1
= control target key start
LH: loop header
LB: loop body
LE: loop exit
PB: predicated region body
PF: predicated region fallthrough
CT: control target
= control target key end

     0   :  { %s6027_s0 = inlined_call_operand.vmem [shape: f32[2,18,18,4], index: 0, kind: input, shape index: {}]   ;;  %s6028_s1 = inlined_call_operand.vmem [shape: f32[4,4], index: 1, kind: input, shape index: {}]   ;;  %s6029_s2 = inlined_call_operand.vmem [shape: f32[1,4], index: 2, kind: input, shape index: {}]   ;;  %s6030_s3 = inlined_call_operand.vmem [shape: f32[3,12,4], index: 3, kind: input, shape index: {}]   ;;  %s6031_s4 = inlined_call_operand.vmem [shape: f32[1,4], index: 4, kind: input, shape index: {}]   ;;  %s6032_s5 = inlined_call_operand.vmem [shape: f32[4,16], index: 5, kind: input, shape index: {}]   ;;  %s6033_s6 = inlined_call_operand.vmem [shape: f32[1,16], index: 6, kind: input, shape index: {}]   ;;  %s6034_s7 = inlined_call_operand.vmem [shape: f32[4,16], index: 7, kind: input, shape index: {}]   ;;  %s6035_s8 = inlined_call_operand.vmem [shape: f32[1,16], index: 8, kind: input, shape index: {}]   ;;  %s6036_s9 = inlined_call_operand.hbm [shape: f32[2,16,16,16], index: 9, kind: output, shape index: {}]  }
   0x1   :  { %6038 = sst [smem:[#allocation5_spill]] %s6027_s0 }
   0x2   :  { %6039 = sst [smem:[#allocation6_spill]] %s6028_s1 }
   0x3   :  { %14 = vsyncpa [#allocation3], 0 }
   0x4   :  { %16 = vsyncpa [#allocation3 + $0x1], 0  ;;  %s4681_s30 = smov 0   ;;  %s4683_s10 = smov 0  }
   0x5   :  { %s4685_s11 = smov 0   ;;  %s4687_s12 = smov 0  }
   0x6   :  { %s4689_s13 = smov 0   ;;  %s4691_s14 = smov 0  }
   0x7   :  { %s4693_s15 = smov 0   ;;  %s4695_s16 = smov 0  }
   0x8 LB: > { %s3945_s17 = sadd.s32 4294967295, %s4622_s16   ;;  %s3946_s18 = sadd.s32 4294967294, %s4622_s16   ;;  %s4622_s16 = sphi %s4695_s16, %s22_s16   ;;  %s4618_s15 = sphi %s4693_s15, %s6087_s15   ;;  %s4614_s14 = sphi %s4691_s14, %s6086_s14   ;;  %s4610_s13 = sphi %s4689_s13, %s6085_s13   ;;  %s4606_s12 = sphi %s4687_s12, %s6084_s12   ;;  %s4602_s11 = sphi %s4685_s11, %s6083_s11   ;;  %s4598_s10 = sphi %s4683_s10, %s6082_s10   ;;  %s4594_s30 = sphi %s4681_s30, %s6081_s30  }
   0x9   : > { %s31_s19 = sadd.s32 1, %s4614_s14  ;;  %s34_s20 = sadd.s32 1, %s4618_s15 }
   0xa   : > { %p32_p0 = scmp.ge.s32.totalorder %s31_s19, 2  ;;  %p247_p1 = scmp.ne.s32.totalorder %s4602_s11, %s4598_s10 }
   0xb   : > { %p248_p2 = scmp.eq.s32.totalorder %s3945_s17, 3  ;;  %p253_p5 = scmp.ne.s32.totalorder %s4598_s10, %s4594_s30 }
   0xc   : > { %s6089_s19 = smov (%p32_p0, %s31_s19), 0  ;;  %s6091_s20 = smov (!%p32_p0, %s34_s20), %s4618_s15 }
   0xd   : > { %s233_s21 = ssub.s32 %s4614_s14, %s6089_s19  ;;  %p4732_p3 = por %p248_p2, %p247_p1 }
   0xe   : > { %p36_p4 = scmp.ge.s32.totalorder %s6091_s20, 2  ;;  %p254_p6 = scmp.eq.s32.totalorder %s3946_s18, 3 }
   0xf   : > { %p3949_p7 = scmp.ge.s32.totalorder %s4622_s16, 1  ;;  %p304_p9 = scmp.lt.s32.totalorder %s4622_s16, 5 }
  0x10   : > { %s6093_s20 = smov (%p36_p4, %s6091_s20), 0  ;;  %p4741_p8 = por %p254_p6, %p253_p5 }
  0x11   : > { %s232_s24 = ssub.s32 %s4618_s15, %s6093_s20  ;;  %s237_s25 = sadd.s32 1, %s4602_s11 }
  0x12   : > { %s234_s26 = sor.u32 %s233_s21, %s232_s24  ;;  %p305_p10 = pnand %p3949_p7, %p304_p9 }
  0x13   : > { %p235_p11 = scmp.eq.s32.totalorder %s234_s26, 0  ;;  %s6042_s1 = sld [smem:[#allocation6_spill]] (!%p305_p10) }
  0x14   : > { %308 = sbr.rel (%p305_p10) target bundleno = 946 (0x3b2), region = 56  ;;  %p340_p12 = scmp.lt.s32.totalorder (!%p305_p10), %s4610_s13, 1 }
  0x15   : > { %s4750_s27 = scalar_select %p235_p11, %s4602_s11, %s237_s25  }
  0x16   : > { %s3953_s18 = smul.u32 (!%p305_p10), 192, %s4606_s12  ;;  %s6043_s0 = sld [smem:[#allocation5_spill]] (!%p305_p10) }
  0x17   : > { %s4627_s25 = smov (!%p305_p10), 4   ;;  %s4076_s24 = sshll.u32 (!%p305_p10), %s4610_s13, 5 }
  0x19   : > { %v819_v0 = vld [vmem:[%s6042_s1] sm:$0xf]  ;;  %vm1256_vm0 = vcmask 1043456   ;;  %v413_v1 = vlaneseq  ;;  %v4624_v2 = vmov 0.0   ;;  %vm4625_vm1 = vmmov 0   ;;  %s341_s17 = scalar_select %p340_p12, %s4610_s13, 1 }
  0x1a   : > { %4193 = vmatprep.subr.mxu0 %v4624_v2  ;;  %4195 = vmatprep.mubr.msk.f32.mxu0 %vm4625_vm1, %v4624_v2  ;;  %v4626_v3 = vmov 1983009808   ;;  %vm1209_vm2 = vcmask 31744   ;;  %vm2532_vm11 = vcmask 1046528  }
  0x1b   : > { %4194 = vmatpush3.msk.msra.mxu0 %vm1256_vm0, %v819_v0  ;;  %v411_v4 = vunpack.c.l.s4 %v4626_v3  ;;  %v4761_v5 = vshrl.u32 %v413_v1, 7  ;;  %s4400_s21 = smul.u32 432, %s341_s17  ;;  %s6037_s17 = smov 8  }
  0x1d   : > { %v412_v6 = vunpack.c.0.s8 %v411_v4  ;;  %s344_s26 = scalar_lea.vmem %s6043_s0, %s4400_s21  ;;  %vm1912_vm5 = vcmp.ge.s32.totalorder %v4761_v5, 1  ;;  %s4080_s21 = sshll.u32 %s4606_s12, 4 }
  0x1e   : > { %s4770_s28 = scalar_lea.vmem %s344_s26, %s3953_s18  ;;  %s3952_s18 = sshll.u32 %s4606_s12, 3 }
  0x1f   : > { %v4768_v7 = vsub.s32 %v412_v6, %v4761_v5  ;;  %v349_v8 = vld [vmem:[%s4770_s28] sm:$0xff]  ;;  %v350_v9 = vld [vmem:[%s4770_s28 + $0x8] sm:$0xff]  ;;  %v352_v14 = vld [vmem:[%s4770_s28 + $0x18] sm:$0xff]  ;;  %s3864_s12 = sadd.s32 %s4080_s21, %s4076_s24 }
  0x20   : > { %v409_v10 = vcombine.high %v349_v8, %v349_v8  ;;  %v426_v12 = vcombine.high %v350_v9, %v350_v9  ;;  %v353_v15 = vld [vmem:[%s4770_s28 + $0x20] sm:$0xff]  ;;  %v450_v16 = vcombine.high %v352_v14, %v352_v14  ;;  %v3954_v24 = vld.sshfl [vmem:[%s4770_s28 + $0x10] sm:$0x3 pattern:$0x76325410]  ;;  %v356_v45 = vld [vmem:[%s4770_s28 + $0x38] sm:$0xff] }
  0x21   : > { %v416_v11 = vrot.slane %v349_v8, %v4768_v7  ;;  %v433_v13 = vrot.slane %v350_v9, %v4768_v7  ;;  %v457_v17 = vrot.slane %v352_v14, %v4768_v7  ;;  %v467_v18 = vcombine.high %v353_v15, %v353_v15  ;;  %v355_v34 = vld [vmem:[%s4770_s28 + $0x30] sm:$0xff]  ;;  %v4522_v43 = vld.sshfl [vmem:[%s4770_s28 + $0x28] sm:$0x3 pattern:$0x76325410]  ;;  %s4077_s26 = sshll.u32 %s3864_s12, 7 }
  0x22   : > { %v474_v19 = vrot.slane %v353_v15, %v4768_v7  ;;  %v423_v20 = vrot.slane %v409_v10, %v4768_v7  ;;  %v440_v22 = vrot.slane %v426_v12, %v4768_v7  ;;  %v464_v25 = vrot.slane %v450_v16, %v4768_v7  ;;  %v358_v58 = vld [vmem:[%s4770_s28 + $0x48] sm:$0xff]  ;;  %v4523_v0 = vld.sshfl [vmem:[%s4770_s28 + $0x40] sm:$0x3 pattern:$0x76325410]  ;;  %v359_v8 = vld [vmem:[%s4770_s28 + $0x50] sm:$0xff]  ;;  %s5969_s21 = scalar_lea.hbm %s6036_s9, %s4077_s26 }
  0x23   : > { %v424_v21 = vcombine.high %v416_v11, %v416_v11  ;;  %v441_v23 = vcombine.high %v433_v13, %v433_v13  ;;  %v465_v26 = vcombine.high %v457_v17, %v457_v17  ;;  %v861_v31 = vcombine.low %v3954_v24, %v457_v17 }
  0x24   : > { %v425_v27 = vcombine.high %v423_v20, %v423_v20  ;;  %v442_v29 = vcombine.high %v440_v22, %v440_v22  ;;  %v466_v32 = vcombine.high %v464_v25, %v464_v25  ;;  %v481_v33 = vrot.slane %v467_v18, %v4768_v7  ;;  %v361_v18 = vld [vmem:[%s4770_s28 + $0x60] sm:$0xff] }
  0x25   : > { %v827_v28 = vcombine.low %v416_v11, %v424_v21  ;;  %v844_v30 = vcombine.low %v433_v13, %v441_v23  ;;  %v482_v38 = vcombine.high %v474_v19, %v474_v19  ;;  %v862_v39 = vcombine.low %v465_v26, %v464_v25 }
  0x26   : > { %v828_v35 = vcombine.low %v423_v20, %v425_v27  ;;  %v845_v37 = vcombine.low %v440_v22, %v442_v29  ;;  %v498_v44 = vrot.slane %v355_v34, %v4768_v7  ;;  %v491_v46 = vcombine.high %v355_v34, %v355_v34 }
  0x27   : > { %v835_v36 = vrot.slane %v827_v28, %v4768_v7  ;;  %v852_v41 = vrot.slane %v844_v30, %v4768_v7  ;;  %v869_v48 = vrot.slane %v861_v31, %v4768_v7  ;;  %v878_v49 = vcombine.low %v466_v32, %v474_v19  ;;  %v4524_v28 = vld.sshfl [vmem:[%s4770_s28 + $0x58] sm:$0x3 pattern:$0x76325410]  ;;  %v362_v30 = vld [vmem:[%s4770_s28 + $0x68] sm:$0xff] }
  0x28   : > { %v842_v40 = vrot.slane %v828_v35, %v4768_v7  ;;  %v859_v42 = vrot.slane %v845_v37, %v4768_v7  ;;  %v879_v50 = vcombine.low %v482_v38, %v481_v33  ;;  %v483_v51 = vcombine.high %v481_v33, %v481_v33 }
  0x29   : > { %v505_v52 = vrot.slane %v491_v46, %v4768_v7  ;;  %v515_v53 = vrot.slane %v356_v45, %v4768_v7  ;;  %v876_v55 = vrot.slane %v862_v39, %v4768_v7  ;;  %v506_v56 = vcombine.high %v498_v44, %v498_v44 }
  0x2a   : > { %v843_v47 = vcombine.low %v835_v36, %v842_v40  ;;  %v860_v54 = vcombine.low %v852_v41, %v859_v42  ;;  %v508_v57 = vcombine.high %v356_v45, %v356_v45  ;;  %v886_v59 = vrot.slane %v878_v49, %v4768_v7 }
  0x2b   : > { %v893_v60 = vrot.slane %v879_v50, %v4768_v7  ;;  %v895_v61 = vcombine.low %v483_v51, %v4522_v43  ;;  %v507_v62 = vcombine.high %v505_v52, %v505_v52  ;;  %v523_v63 = vcombine.high %v515_v53, %v515_v53  ;;  %v364_v50 = vld [vmem:[%s4770_s28 + $0x78] sm:$0xff] }
  0x2c   : > { %4196 = vmatmul.mubr.msk.f32.vlgmr.msra.gmra.mxu0 %vm1209_vm2, %v843_v47  ;;  %v877_v1 = vcombine.low %v869_v48, %v876_v55  ;;  %v896_v3 = vcombine.low %v498_v44, %v506_v56  ;;  %v522_v4 = vrot.slane %v508_v57, %v4768_v7  ;;  %v532_v6 = vcombine.high %v358_v58, %v358_v58 }
  0x2d   : > { %4198 = vmatprep.mubr.msk.f32.mxu0 %vm4625_vm1, %v4624_v2  ;;  %v539_v9 = vrot.slane %v358_v58, %v4768_v7  ;;  %v894_v10 = vcombine.low %v886_v59, %v893_v60  ;;  %v903_v11 = vrot.slane %v895_v61, %v4768_v7  ;;  %v912_v12 = vcombine.low %v505_v52, %v507_v62  ;;  %v365_v61 = vld [vmem:[%s4770_s28 + $0x80] sm:$0xff] }
  0x2e   : > { %v913_v13 = vcombine.low %v515_v53, %v523_v63  ;;  %v910_v14 = vrot.slane %v896_v3, %v4768_v7  ;;  %v524_v15 = vcombine.high %v522_v4, %v522_v4  ;;  %v546_v16 = vrot.slane %v532_v6, %v4768_v7 }
  0x2f   : > { %v549_v17 = vcombine.high %v359_v8, %v359_v8  ;;  %v930_v19 = vcombine.low %v4523_v0, %v539_v9  ;;  %v547_v20 = vcombine.high %v539_v9, %v539_v9  ;;  %v920_v21 = vrot.slane %v912_v12, %v4768_v7 }
  0x30   : > { %4199 = vmatmul.mubr.msk.f32.gmra.mxu0 %vm1209_vm2, %v860_v54  ;;  %v927_v22 = vrot.slane %v913_v13, %v4768_v7  ;;  %v556_v23 = vrot.slane %v359_v8, %v4768_v7  ;;  %v573_v24 = vcombine.high %v361_v18, %v361_v18  ;;  %v911_v25 = vcombine.low %v903_v11, %v910_v14  ;;  %v4525_v54 = vld.sshfl [vmem:[%s4770_s28 + $0x70] sm:$0x3 pattern:$0x76325410] }
  0x31   : > { %4201 = vmatprep.mubr.msk.f32.mxu0 %vm4625_vm1, %v4624_v2  ;;  %v929_v26 = vcombine.low %v522_v4, %v524_v15  ;;  %v548_v27 = vcombine.high %v546_v16, %v546_v16  ;;  %v563_v29 = vrot.slane %v549_v17, %v4768_v7  ;;  %v944_v31 = vrot.slane %v930_v19, %v4768_v7 }
  0x32   : > { %v564_v32 = vcombine.high %v556_v23, %v556_v23  ;;  %v580_v33 = vrot.slane %v361_v18, %v4768_v7  ;;  %v928_v34 = vcombine.low %v920_v21, %v927_v22  ;;  %v946_v35 = vcombine.low %v547_v20, %v546_v16  ;;  %v4526_v20 = vld.sshfl [vmem:[%s4770_s28 + $0x88] sm:$0x3 pattern:$0x76325410]  ;;  %v368_v22 = vld [vmem:[%s4770_s28 + $0x98] sm:$0xff] }
  0x33   : > { %v587_v36 = vrot.slane %v573_v24, %v4768_v7  ;;  %v937_v37 = vrot.slane %v929_v26, %v4768_v7  ;;  %v947_v38 = vcombine.low %v548_v27, %v556_v23  ;;  %v565_v39 = vcombine.high %v563_v29, %v563_v29 }
  0x34   : > { %4202 = vmatmul.mubr.msk.f32.gmra.mxu0 %vm1209_vm2, %v877_v1  ;;  %v590_v40 = vcombine.high %v362_v30, %v362_v30  ;;  %v588_v41 = vcombine.high %v580_v33, %v580_v33  ;;  %v954_v42 = vrot.slane %v946_v35, %v4768_v7  ;;  %v963_v43 = vcombine.low %v564_v32, %v563_v29 }
  0x35   : > { %4204 = vmatprep.mubr.msk.f32.mxu0 %vm4625_vm1, %v4624_v2  ;;  %v589_v44 = vcombine.high %v587_v36, %v587_v36  ;;  %v597_v45 = vrot.slane %v362_v30, %v4768_v7  ;;  %v945_v46 = vcombine.low %v937_v37, %v944_v31  ;;  %v961_v47 = vrot.slane %v947_v38, %v4768_v7 }
  0x36   : > { %v964_v48 = vcombine.low %v565_v39, %v4524_v28  ;;  %v604_v49 = vrot.slane %v590_v40, %v4768_v7  ;;  %v980_v51 = vcombine.low %v580_v33, %v588_v41  ;;  %v614_v55 = vcombine.high %v364_v50, %v364_v50  ;;  %v370_v33 = vld [vmem:[%s4770_s28 + $0xa8] sm:$0xff]  ;;  %v4527_v39 = vld.sshfl [vmem:[%s4770_s28 + $0xa0] sm:$0x3 pattern:$0x76325410] }
  0x37   : > { %v981_v52 = vcombine.low %v587_v36, %v589_v44  ;;  %v605_v53 = vcombine.high %v597_v45, %v597_v45  ;;  %v621_v56 = vrot.slane %v364_v50, %v4768_v7  ;;  %v962_v57 = vcombine.low %v954_v42, %v961_v47 }
  0x38   : > { %4205 = vmatmul.mubr.msk.f32.gmra.mxu0 %vm1209_vm2, %v894_v10  ;;  %v971_v58 = vrot.slane %v963_v43, %v4768_v7  ;;  %v978_v59 = vrot.slane %v964_v48, %v4768_v7  ;;  %v606_v60 = vcombine.high %v604_v49, %v604_v49  ;;  %v988_v62 = vrot.slane %v980_v51, %v4768_v7  ;;  %v367_v10 = vld [vmem:[%s4770_s28 + $0x90] sm:$0xff] }
  0x39   : > { %4207 = vmatprep.mubr.msk.f32.mxu0 %vm4625_vm1, %v4624_v2  ;;  %v995_v63 = vrot.slane %v981_v52, %v4768_v7  ;;  %v997_v0 = vcombine.low %v597_v45, %v605_v53  ;;  %v628_v1 = vrot.slane %v614_v55, %v4768_v7  ;;  %v629_v3 = vcombine.high %v621_v56, %v621_v56  ;;  %v371_v43 = vld [vmem:[%s4770_s28 + $0xb0] sm:$0xff] }
  0x3a   : > { %v979_v4 = vcombine.low %v971_v58, %v978_v59  ;;  %v998_v6 = vcombine.low %v604_v49, %v606_v60  ;;  %v631_v8 = vcombine.high %v365_v61, %v365_v61  ;;  %v638_v9 = vrot.slane %v365_v61, %v4768_v7 }
  0x3b   : > { %v1014_v11 = vcombine.low %v4525_v54, %v621_v56  ;;  %v630_v12 = vcombine.high %v628_v1, %v628_v1  ;;  %v996_v13 = vcombine.low %v988_v62, %v995_v63  ;;  %v1005_v14 = vrot.slane %v997_v0, %v4768_v7  ;;  %v373_v54 = vld [vmem:[%s4770_s28 + $0xc0] sm:$0xff]  ;;  %v4528_v0 = vld.sshfl [vmem:[%s4770_s28 + $0xb8] sm:$0x3 pattern:$0x76325410] }
  0x3c   : > { %4208 = vmatmul.mubr.msk.f32.gmra.mxu0 %vm1209_vm2, %v911_v25  ;;  %v1015_v15 = vcombine.low %v629_v3, %v628_v1  ;;  %v655_v16 = vcombine.high %v367_v10, %v367_v10  ;;  %v1012_v17 = vrot.slane %v998_v6, %v4768_v7  ;;  %v645_v18 = vrot.slane %v631_v8, %v4768_v7  ;;  %v374_v3 = vld [vmem:[%s4770_s28 + $0xc8] sm:$0xff] }
  0x3d   : > { %4210 = vmatprep.mubr.msk.f32.mxu0 %vm4625_vm1, %v4624_v2  ;;  %v646_v19 = vcombine.high %v638_v9, %v638_v9  ;;  %v662_v21 = vrot.slane %v367_v10, %v4768_v7  ;;  %v1022_v23 = vrot.slane %v1014_v11, %v4768_v7  ;;  %v1031_v24 = vcombine.low %v630_v12, %v638_v9 }
  0x3e   : > { %v647_v25 = vcombine.high %v645_v18, %v645_v18  ;;  %v1029_v26 = vrot.slane %v1015_v15, %v4768_v7  ;;  %v669_v27 = vrot.slane %v655_v16, %v4768_v7  ;;  %v679_v28 = vrot.slane %v368_v22, %v4768_v7 }
  0x3f   : > { %v1013_v29 = vcombine.low %v1005_v14, %v1012_v17  ;;  %v1032_v30 = vcombine.low %v646_v19, %v645_v18  ;;  %v670_v31 = vcombine.high %v662_v21, %v662_v21  ;;  %v672_v32 = vcombine.high %v368_v22, %v368_v22 }
  0x40   : > { %4211 = vmatmul.mubr.msk.f32.gmra.mxu0 %vm1209_vm2, %v928_v34  ;;  %v1039_v34 = vrot.slane %v1031_v24, %v4768_v7  ;;  %v1030_v35 = vcombine.low %v1022_v23, %v1029_v26  ;;  %v1048_v36 = vcombine.low %v647_v25, %v4526_v20  ;;  %v671_v37 = vcombine.high %v669_v27, %v669_v27  ;;  %v376_v25 = vld [vmem:[%s4770_s28 + $0xd8] sm:$0xff] }
  0x41   : > { %4213 = vmatprep.mubr.msk.f32.mxu0 %vm4625_vm1, %v4624_v2  ;;  %v687_v38 = vcombine.high %v679_v28, %v679_v28  ;;  %v1046_v40 = vrot.slane %v1032_v30, %v4768_v7  ;;  %v1049_v41 = vcombine.low %v662_v21, %v670_v31  ;;  %v686_v42 = vrot.slane %v672_v32, %v4768_v7  ;;  %v4529_v30 = vld.sshfl [vmem:[%s4770_s28 + $0xd0] sm:$0x3 pattern:$0x76325410] }
  0x42   : > { %v696_v44 = vcombine.high %v370_v33, %v370_v33  ;;  %v703_v45 = vrot.slane %v370_v33, %v4768_v7  ;;  %v1065_v47 = vcombine.low %v669_v27, %v671_v37  ;;  %v713_v49 = vcombine.high %v371_v43, %v371_v43 }
  0x43   : > { %v1066_v48 = vcombine.low %v679_v28, %v687_v38  ;;  %v1047_v50 = vcombine.low %v1039_v34, %v1046_v40  ;;  %v1063_v51 = vrot.slane %v1049_v41, %v4768_v7  ;;  %v688_v52 = vcombine.high %v686_v42, %v686_v42 }
  0x44   : > { %4214 = vmatmul.mubr.msk.f32.gmra.mxu0 %vm1209_vm2, %v945_v46  ;;  %v1056_v46 = vrot.slane %v1048_v36, %v4768_v7  ;;  %v710_v53 = vrot.slane %v696_v44, %v4768_v7  ;;  %v1083_v55 = vcombine.low %v4527_v39, %v703_v45  ;;  %v720_v56 = vrot.slane %v371_v43, %v4768_v7  ;;  %v377_v36 = vld [vmem:[%s4770_s28 + $0xe0] sm:$0xff] }
  0x45   : > { %4216 = vmatprep.mubr.msk.f32.mxu0 %vm4625_vm1, %v4624_v2  ;;  %v1080_v58 = vrot.slane %v1066_v48, %v4768_v7  ;;  %v711_v59 = vcombine.high %v703_v45, %v703_v45  ;;  %v727_v60 = vrot.slane %v713_v49, %v4768_v7  ;;  %v1082_v62 = vcombine.low %v686_v42, %v688_v52 }
  0x46   : > { %v1064_v61 = vcombine.low %v1056_v46, %v1063_v51  ;;  %v712_v63 = vcombine.high %v710_v53, %v710_v53  ;;  %v737_v1 = vcombine.high %v373_v54, %v373_v54  ;;  %v728_v6 = vcombine.high %v720_v56, %v720_v56 }
  0x47   : > { %v744_v8 = vrot.slane %v373_v54, %v4768_v7  ;;  %v1099_v10 = vcombine.low %v711_v59, %v710_v53  ;;  %v729_v11 = vcombine.high %v727_v60, %v727_v60  ;;  %v1090_v12 = vrot.slane %v1082_v62, %v4768_v7 }
  0x48   : > { %4217 = vmatmul.mubr.msk.f32.gmra.mxu0 %vm1209_vm2, %v962_v57  ;;  %v1073_v57 = vrot.slane %v1065_v47, %v4768_v7  ;;  %v751_v14 = vrot.slane %v737_v1, %v4768_v7  ;;  %v754_v15 = vcombine.high %v374_v3, %v374_v3  ;;  %v1116_v18 = vcombine.low %v728_v6, %v727_v60 }
  0x49   : > { %4219 = vmatprep.mubr.msk.f32.mxu0 %vm4625_vm1, %v4624_v2  ;;  %v752_v16 = vcombine.high %v744_v8, %v744_v8  ;;  %v1107_v17 = vrot.slane %v1099_v10, %v4768_v7  ;;  %v1117_v19 = vcombine.low %v729_v11, %v4528_v0  ;;  %v761_v20 = vrot.slane %v374_v3, %v4768_v7 }
  0x4a   : > { %v1081_v9 = vcombine.low %v1073_v57, %v1080_v58  ;;  %v753_v23 = vcombine.high %v751_v14, %v751_v14  ;;  %v768_v24 = vrot.slane %v754_v15, %v4768_v7  ;;  %v1124_v27 = vrot.slane %v1116_v18, %v4768_v7 }
  0x4b   : > { %v1133_v26 = vcombine.low %v744_v8, %v752_v16  ;;  %v1131_v28 = vrot.slane %v1117_v19, %v4768_v7  ;;  %v778_v31 = vcombine.high %v376_v25, %v376_v25  ;;  %v795_v41 = vcombine.high %v377_v36, %v377_v36 }
  0x4c   : > { %4220 = vmatmul.mubr.msk.f32.gmra.mxu0 %vm1209_vm2, %v979_v4  ;;  %v1097_v4 = vrot.slane %v1083_v55, %v4768_v7  ;;  %v1134_v33 = vcombine.low %v751_v14, %v753_v23  ;;  %v770_v34 = vcombine.high %v768_v24, %v768_v24  ;;  %v802_v45 = vrot.slane %v377_v36, %v4768_v7 }
  0x4d   : > { %4222 = vmatprep.mubr.msk.f32.mxu0 %vm4625_vm1, %v4624_v2  ;;  %v1141_v37 = vrot.slane %v1133_v26, %v4768_v7  ;;  %v1132_v38 = vcombine.low %v1124_v27, %v1131_v28  ;;  %v792_v40 = vrot.slane %v778_v31, %v4768_v7  ;;  %v809_v49 = vrot.slane %v795_v41, %v4768_v7 }
  0x4e   : > { %v1098_v21 = vcombine.low %v1090_v12, %v1097_v4  ;;  %v1148_v42 = vrot.slane %v1134_v33, %v4768_v7  ;;  %v1151_v43 = vcombine.low %v768_v24, %v770_v34  ;;  %v810_v53 = vcombine.high %v802_v45, %v802_v45  ;;  %v4957_v4 = vld [vmem:[%s6029_s2] ss:$0 sm:$0xff] }
  0x4f   : > { %v794_v48 = vcombine.high %v792_v40, %v792_v40  ;;  %v811_v62 = vcombine.high %v809_v49, %v809_v49  ;;  %v4967_v19 = vadd.s32 16, %v4761_v5 }
  0x50   : > { %4223 = vmatmul.mubr.msk.f32.gmra.mxu0 %vm1209_vm2, %v996_v13  ;;  %v1100_v13 = vcombine.low %v712_v63, %v720_v56  ;;  %v1165_v51 = vrot.slane %v1151_v43, %v4768_v7  ;;  %v1185_v58 = vcombine.low %v810_v53, %v809_v49  ;;  %v3955_v63 = vld.sshfl [vmem:[%s4770_s28 + $0xe8] sm:$0x3 pattern:$0x76325410] }
  0x51   : > { %4225 = vmatprep.mubr.msk.f32.mxu0 %vm4625_vm1, %v4624_v2  ;;  %v1184_v57 = vcombine.low %v794_v48, %v802_v45  ;;  %v1201_v1 = vcombine.low %v811_v62, %v3955_v63  ;;  %vm1947_vm6 = vcmp.le.s32.totalorder %v4967_v19, 16 }
  0x52   : > { %v1114_v22 = vrot.slane %v1100_v13, %v4768_v7 }
  0x53   : > { %v1192_v60 = vrot.slane %v1184_v57, %v4768_v7  ;;  %v1208_v3 = vrot.slane %v1201_v1, %v4768_v7 }
  0x54   : > { %4226 = vmatmul.mubr.msk.f32.gmra.mxu0 %vm1209_vm2, %v1013_v29  ;;  %v769_v29 = vcombine.high %v761_v20, %v761_v20  ;;  %v1115_v32 = vcombine.low %v1107_v17, %v1114_v22 }
  0x55   : > { %4228 = vmatprep.mubr.msk.f32.mxu0 %vm4625_vm1, %v4624_v2 }
  0x56   : > { %v1150_v39 = vcombine.low %v761_v20, %v769_v29 }
  0x58   : > { %4229 = vmatmul.mubr.msk.f32.gmra.mxu0 %vm1209_vm2, %v1030_v35  ;;  %v785_v35 = vrot.slane %v376_v25, %v4768_v7  ;;  %v1158_v46 = vrot.slane %v1150_v39, %v4768_v7 }
  0x59   : > { %4231 = vmatprep.mubr.msk.f32.mxu0 %vm4625_vm1, %v4624_v2 }
  0x5a   : > { %v793_v44 = vcombine.high %v785_v35, %v785_v35  ;;  %v1167_v47 = vcombine.low %v4529_v30, %v785_v35  ;;  %v1166_v55 = vcombine.low %v1158_v46, %v1165_v51 }
  0x5c   : > { %4232 = vmatmul.mubr.msk.f32.gmra.mxu0 %vm1209_vm2, %v1047_v50  ;;  %v1149_v50 = vcombine.low %v1141_v37, %v1148_v42  ;;  %v1168_v52 = vcombine.low %v793_v44, %v792_v40  ;;  %v1175_v54 = vrot.slane %v1167_v47, %v4768_v7 }
  0x5d   : > { %4234 = vmatprep.mubr.msk.f32.mxu0 %vm4625_vm1, %v4624_v2 }
  0x5e   : > { %v1182_v56 = vrot.slane %v1168_v52, %v4768_v7 }
  0x60   : > { %4235 = vmatmul.mubr.msk.f32.gmra.mxu0 %vm1209_vm2, %v1064_v61  ;;  %v1183_v59 = vcombine.low %v1175_v54, %v1182_v56  ;;  %v1199_v61 = vrot.slane %v1185_v58, %v4768_v7 }
  0x61   : > { %4237 = vmatprep.mubr.msk.f32.mxu0 %vm4625_vm1, %v4624_v2 }
  0x62   : > { %v1200_v0 = vcombine.low %v1192_v60, %v1199_v61 }
  0x64   : > { %4238 = vmatmul.mubr.msk.f32.gmra.mxu0 %vm1209_vm2, %v1081_v9 }
  0x65   : > { %4240 = vmatprep.mubr.msk.f32.mxu0 %vm4625_vm1, %v4624_v2 }
  0x68   : > { %4241 = vmatmul.mubr.msk.f32.gmra.mxu0 %vm1209_vm2, %v1098_v21 }
  0x69   : > { %4243 = vmatprep.mubr.msk.f32.mxu0 %vm4625_vm1, %v4624_v2 }
  0x6c   : > { %4244 = vmatmul.mubr.msk.f32.gmra.mxu0 %vm1209_vm2, %v1115_v32 }
  0x6d   : > { %4246 = vmatprep.mubr.msk.f32.mxu0 %vm4625_vm1, %v4624_v2 }
  0x70   : > { %4247 = vmatmul.mubr.msk.f32.gmra.mxu0 %vm1209_vm2, %v1132_v38 }
  0x71   : > { %4249 = vmatprep.mubr.msk.f32.mxu0 %vm4625_vm1, %v4624_v2 }
  0x74   : > { %4250 = vmatmul.mubr.msk.f32.gmra.mxu0 %vm1209_vm2, %v1149_v50 }
  0x75   : > { %4252 = vmatprep.mubr.msk.f32.mxu0 %vm4625_vm1, %v4624_v2 }
  0x78   : > { %4253 = vmatmul.mubr.msk.f32.gmra.mxu0 %vm1209_vm2, %v1166_v55 }
  0x79   : > { %4255 = vmatprep.mubr.msk.f32.mxu0 %vm4625_vm1, %v4624_v2 }
  0x7c   : > { %4256 = vmatmul.mubr.msk.f32.gmra.mxu0 %vm1209_vm2, %v1183_v59 }
  0x7d   : > { %4258 = vmatprep.mubr.msk.f32.mxu0 %vm4625_vm1, %v4624_v2 }
  0x80   : > { %4259 = vmatmul.mubr.msk.f32.gmra.mxu0 %vm1209_vm2, %v1200_v0 }
  0x81   : > { %4261 = vmatprep.mubr.msk.f32.mxu0 %vm4625_vm1, %v4624_v2  ;;  %v4963_v2 = vstv %s3952_s18 }
  0x82   : > { %vm1882_vm3 = vcmp.ge.s32.totalorder %v4963_v2, 1  ;;  %vm1892_vm4 = vcmp.le.s32.totalorder %v4963_v2, 16  ;;  %v1869_v21 = vadd.s32 1, %v4963_v2  ;;  %v4990_v42 = vadd.s32 2, %v4963_v2 }
  0x83   : > { %vm4982_vm7 = vmand %vm1882_vm3, %vm1892_vm4  ;;  %v4993_v43 = vadd.s32 3, %v4963_v2  ;;  %v5004_v48 = vadd.s32 4, %v4963_v2  ;;  %v5021_v62 = vadd.s32 5, %v4963_v2  ;;  %vm2621_vm3 = vcmask 1045504  }
  0x84   : > { %4262 = vmatmul.mubr.msk.f32.gmra.mxu0 %vm1209_vm2, %v1208_v3  ;;  %vm1883_vm8 = vcmp.ge.s32.totalorder %v1869_v21, 1  ;;  %vm1893_vm9 = vcmp.le.s32.totalorder %v1869_v21, 16  ;;  %vm4999_vm10 = vmand %vm4982_vm7, %vm1912_vm5  ;;  %vm1884_vm14 = vcmp.ge.s32.totalorder %v4990_v42, 1  ;;  %vm1894_vm15 = vcmp.le.s32.totalorder %v4990_v42, 16 }
  0x85   : > { %vm1950_vm12 = vmand %vm4982_vm7, %vm1947_vm6 }
  0x86   : > { %vm5033_vm13 = vmand %vm1883_vm8, %vm1893_vm9  ;;  %vm1885_vm8 = vcmp.ge.s32.totalorder %v4993_v43, 1  ;;  %vm1895_vm9 = vcmp.le.s32.totalorder %v4993_v43, 16 }
  0x87   : > { %vm5057_vm1 = vmand %vm5033_vm13, %vm1912_vm5 }
  0x88   : > { %vm5079_vm4 = vmand %vm5033_vm13, %vm1947_vm6 }
  0xec   : > { %v1326_v6 = vpop.f32.mrf.mxu0 }
  0xed   : > { %v1327_v8 = vadd.f32 %v4957_v4, %v1326_v6 }
  0xee   : > { %v4197_v9 = vpop.f32.mrf.mxu0 }
  0xef   : > { %v1440_v10 = vmax.f32 %v1327_v8, 0.0 }
  0xf0   : > { %v1331_v11 = vpop.f32.mrf.mxu0 }
  0xf1   : > { %v1486_v12 = vcombine.high %v1440_v10, %v1440_v10  ;;  %v1493_v13 = vrot.slane %v1440_v10, %v4768_v7  ;;  %v1332_v14 = vadd.f32 %v4957_v4, %v1331_v11  ;;  %v5028_v11 = vadd.s32 6, %v4963_v2 }
  0xf2   : > { %v4200_v15 = vpop.f32.mrf.mxu0 }
  0xf3   : > { %v1500_v16 = vrot.slane %v1486_v12, %v4768_v7  ;;  %v1501_v17 = vcombine.high %v1493_v13, %v1493_v13  ;;  %v1441_v18 = vmax.f32 %v1332_v14, 0.0 }
  0xf4   : > { %v1336_v20 = vpop.f32.mrf.mxu0 }
  0xf5   : > { %v1502_v22 = vcombine.high %v1500_v16, %v1500_v16  ;;  %v2038_v23 = vcombine.low %v1493_v13, %v1501_v17  ;;  %v1503_v24 = vcombine.high %v1441_v18, %v1441_v18  ;;  %v1510_v25 = vrot.slane %v1441_v18, %v4768_v7 }
  0xf6   : > { %v1337_v26 = vadd.f32 %v4957_v4, %v1336_v20  ;;  %v4203_v27 = vpop.f32.mrf.mxu0 }
  0xf7   : > { %v2039_v28 = vcombine.low %v1500_v16, %v1502_v22  ;;  %v1517_v29 = vrot.slane %v1503_v24, %v4768_v7  ;;  %v1518_v30 = vcombine.high %v1510_v25, %v1510_v25  ;;  %v2046_v31 = vrot.slane %v2038_v23, %v4768_v7  ;;  %v3982_v27 = vld [vmem:[%s6030_s3 + $0x18] sm:$0xf] }
  0xf8   : > { %v1442_v32 = vmax.f32 %v1337_v26, 0.0  ;;  %v1341_v33 = vpop.f32.mrf.mxu0  ;;  %4264 = vmatprep.subr.msk.mxu1 %vm1256_vm0, %v3982_v27 }
  0xf9   : > { %v2053_v35 = vrot.slane %v2039_v28, %v4768_v7  ;;  %v1519_v36 = vcombine.high %v1517_v29, %v1517_v29  ;;  %v2055_v37 = vcombine.low %v1510_v25, %v1518_v30  ;;  %v1342_v38 = vadd.f32 %v4957_v4, %v1341_v33  ;;  %4265 = vmatpush3.msk.msra.mxu1 %vm1256_vm0, %v3982_v27 }
  0xfa   : > { %v1520_v39 = vcombine.high %v1442_v32, %v1442_v32  ;;  %v1527_v40 = vrot.slane %v1442_v32, %v4768_v7  ;;  %v4206_v41 = vpop.f32.mrf.mxu0 }
  0xfb   : > { %v2054_v44 = vcombine.low %v2046_v31, %v2053_v35  ;;  %v2056_v45 = vcombine.low %v1517_v29, %v1519_v36  ;;  %v1443_v46 = vmax.f32 %v1342_v38, 0.0  ;;  %v2063_v49 = vrot.slane %v2055_v37, %v4768_v7 }
  0xfc   : > { %v1534_v50 = vrot.slane %v1520_v39, %v4768_v7  ;;  %v1535_v51 = vcombine.high %v1527_v40, %v1527_v40  ;;  %v2078_v52 = vrot.slane %v1527_v40, %v4768_v7  ;;  %v1346_v53 = vpop.f32.mrf.mxu0 }
  0xfd   : > { %v2070_v54 = vrot.slane %v2056_v45, %v4768_v7  ;;  %v1537_v55 = vcombine.high %v1443_v46, %v1443_v46  ;;  %v1544_v56 = vrot.slane %v1443_v46, %v4768_v7  ;;  %v1347_v57 = vadd.f32 %v4957_v4, %v1346_v53 }
  0xfe   : > { %v2079_v58 = vcombine.low %v1535_v51, %v1534_v50  ;;  %v1536_v59 = vcombine.high %v1534_v50, %v1534_v50  ;;  %v4209_v60 = vpop.f32.mrf.mxu0  ;;  %v5018_v61 = vsel %vm4999_vm10, %v2054_v44, 0.0  ;;  %v5025_v10 = vsel %vm1950_vm12, %v2078_v52, 0.0 }
  0xff   : > { %v2071_v63 = vcombine.low %v2063_v49, %v2070_v54  ;;  %v1551_v0 = vrot.slane %v1537_v55, %v4768_v7  ;;  %v1552_v1 = vcombine.high %v1544_v56, %v1544_v56  ;;  %v1444_v3 = vmax.f32 %v1347_v57, 0.0 }
 0x100   : > { %v2087_v6 = vrot.slane %v2079_v58, %v4768_v7  ;;  %v2080_v8 = vcombine.low %v1536_v59, %v1544_v56  ;;  %v1351_v9 = vpop.f32.mrf.mxu0  ;;  %v2533_v23 = vrot.slane %v5018_v61, 1  ;;  %v2536_v26 = vrot.slane %v5025_v10, 1  ;;  %v3981_v56 = vld [vmem:[%s6030_s3 + $0x10] sm:$0xff] }
 0x101   : > { %v2096_v12 = vcombine.low %v1552_v1, %v1551_v0  ;;  %v1553_v13 = vcombine.high %v1551_v0, %v1551_v0  ;;  %v1554_v14 = vcombine.high %v1444_v3, %v1444_v3  ;;  %v1561_v15 = vrot.slane %v1444_v3, %v4768_v7  ;;  %4266 = vmatprep.subr.mxu1 %v3981_v56 }
 0x102   : > { %v2094_v17 = vrot.slane %v2080_v8, %v4768_v7  ;;  %v1352_v18 = vadd.f32 %v4957_v4, %v1351_v9  ;;  %v4212_v20 = vpop.f32.mrf.mxu0  ;;  %v5041_v22 = vsel %vm4982_vm7, %v2071_v63, 0.0  ;;  %v5084_v50 = vadd.s32 7, %v4963_v2  ;;  %4267 = vmatpush3.msra.mxu1 %v3981_v56  ;;  %vm5113_vm7 = vmand %vm1884_vm14, %vm1894_vm15 }
 0x103   : > { %v1568_v21 = vrot.slane %v1554_v14, %v4768_v7  ;;  %v1569_v24 = vcombine.high %v1561_v15, %v1561_v15  ;;  %v2097_v25 = vcombine.low %v1553_v13, %v1561_v15  ;;  %v2104_v29 = vrot.slane %v2096_v12, %v4768_v7  ;;  %vm1921_vm10 = vmand %vm5113_vm7, %vm1912_vm5 }
 0x104   : > { %v2095_v28 = vcombine.low %v2087_v6, %v2094_v17  ;;  %v1445_v30 = vmax.f32 %v1352_v18, 0.0  ;;  %v1356_v31 = vpop.f32.mrf.mxu0  ;;  %v2534_v32 = vrot.slane %v5041_v22, 1  ;;  %vm1886_vm12 = vcmp.ge.s32.totalorder %v5004_v48, 1  ;;  %vm1956_vm14 = vmand %vm5113_vm7, %vm1947_vm6 }
 0x105   : > { %v1570_v34 = vcombine.high %v1568_v21, %v1568_v21  ;;  %v2111_v35 = vrot.slane %v2097_v25, %v4768_v7  ;;  %v2119_v36 = vrot.slane %v1569_v24, %v4768_v7  ;;  %v1357_v37 = vadd.f32 %v4957_v4, %v1356_v31  ;;  %vm5176_vm15 = vmand %vm1885_vm8, %vm1895_vm9 }
 0x106   : > { %v1571_v38 = vcombine.high %v1445_v30, %v1445_v30  ;;  %v1578_v39 = vrot.slane %v1445_v30, %v4768_v7  ;;  %v2535_v40 = vsel %vm2532_vm11, %v2533_v23, %v2534_v32  ;;  %v2537_v41 = vsel %vm2532_vm11, %v2534_v32, %v2536_v26  ;;  %v4215_v44 = vpop.f32.mrf.mxu0 }
 0x107   : > { %v2112_v45 = vcombine.low %v2104_v29, %v2111_v35  ;;  %v1446_v46 = vmax.f32 %v1357_v37, 0.0  ;;  %2573 = vrot.lane.b32.xlu0 %v2535_v40, %s4627_s25  ;;  %2575 = vrot.lane.b32.xlu1 %v2537_v41, %s4627_s25  ;;  %v5073_v47 = vsel %vm5057_vm1, %v2095_v28, 0.0  ;;  %v2120_v51 = vcombine.low %v1568_v21, %v1570_v34  ;;  %vm1924_vm1 = vmand %vm5176_vm15, %vm1912_vm5 }
 0x108   : > { %v1585_v52 = vrot.slane %v1571_v38, %v4768_v7  ;;  %v1586_v53 = vcombine.high %v1578_v39, %v1578_v39  ;;  %v1361_v54 = vpop.f32.mrf.mxu0  ;;  %v2627_v55 = vrot.slane %v5073_v47, 2  ;;  %v2538_v60 = vrot.slane %v5073_v47, 1 }
 0x109   : > { %v1588_v57 = vcombine.high %v1446_v46, %v1446_v46  ;;  %v1595_v58 = vrot.slane %v1446_v46, %v4768_v7  ;;  %v1362_v59 = vadd.f32 %v4957_v4, %v1361_v54  ;;  %v5096_v3 = vsel %vm5033_vm13, %v2112_v45, 0.0 }
 0x10a   : > { %v1587_v63 = vcombine.high %v1585_v52, %v1585_v52  ;;  %v2121_v0 = vcombine.low %v1578_v39, %v1586_v53  ;;  %v4218_v1 = vpop.f32.mrf.mxu0  ;;  %v2483_v6 = vsel %vm5079_vm4, %v2119_v36, 0.0  ;;  %v2628_v13 = vrot.slane %v5096_v3, 2 }
 0x10b   : > { %v5101_v8 = vrot.slane %v1588_v57, %v4768_v7  ;;  %v1603_v9 = vcombine.high %v1595_v58, %v1595_v58  ;;  %v1447_v12 = vmax.f32 %v1362_v59, 0.0  ;;  %v2128_v14 = vrot.slane %v2120_v51, %v4768_v7 }
 0x10c   : > { %v2135_v15 = vrot.slane %v2121_v0, %v4768_v7  ;;  %v2137_v17 = vcombine.low %v1585_v52, %v1587_v63  ;;  %v1366_v18 = vpop.f32.mrf.mxu0  ;;  %v2539_v16 = vrot.slane %v5096_v3, 1  ;;  %v2630_v24 = vrot.slane %v2483_v6, 2 }
 0x10d   : > { %v2138_v20 = vcombine.low %v1595_v58, %v1603_v9  ;;  %v1604_v23 = vcombine.high %v5101_v8, %v5101_v8  ;;  %v1605_v21 = vcombine.high %v1447_v12, %v1447_v12  ;;  %v1612_v28 = vrot.slane %v1447_v12, %v4768_v7 }
 0x10e   : > { %v2136_v26 = vcombine.low %v2128_v14, %v2135_v15  ;;  %v2145_v27 = vrot.slane %v2137_v17, %v4768_v7  ;;  %v1367_v29 = vadd.f32 %v4957_v4, %v1366_v18  ;;  %v4221_v30 = vpop.f32.mrf.mxu0  ;;  %v2629_v33 = vsel %vm2621_vm3, %v2627_v55, %v2628_v13 }
 0x10f   : > { %v2152_v31 = vrot.slane %v2138_v20, %v4768_v7  ;;  %v1619_v32 = vrot.slane %v1605_v21, %v4768_v7  ;;  %v2540_v42 = vsel %vm2532_vm11, %v2538_v60, %v2539_v16  ;;  %v2160_v34 = vrot.slane %v5101_v8, %v4768_v7  ;;  %2666 = vrot.lane.b32.xlu1 %v2629_v33, %s6037_s17 }
 0x110   : > { %v1620_v35 = vcombine.high %v1612_v28, %v1612_v28  ;;  %v2161_v36 = vcombine.low %v1604_v23, %v1612_v28  ;;  %v1448_v37 = vmax.f32 %v1367_v29, 0.0  ;;  %2577 = vrot.lane.b32.xlu0 %v2540_v42, %s4627_s25  ;;  %v1371_v38 = vpop.f32.mrf.mxu0  ;;  %v2541_v44 = vrot.slane %v2483_v6, 1 }
 0x111   : > { %v2153_v39 = vcombine.low %v2145_v27, %v2152_v31  ;;  %v1621_v40 = vcombine.high %v1619_v32, %v1619_v32  ;;  %v1372_v41 = vadd.f32 %v4957_v4, %v1371_v38  ;;  %v2631_v51 = vsel %vm2621_vm3, %v2628_v13, %v2630_v24 }
 0x112   : > { %v2162_v45 = vcombine.low %v1620_v35, %v1619_v32  ;;  %v1622_v46 = vcombine.high %v1448_v37, %v1448_v37  ;;  %v1629_v49 = vrot.slane %v1448_v37, %v4768_v7  ;;  %v4224_v52 = vpop.f32.mrf.mxu0  ;;  %v2542_v54 = vsel %vm2532_vm11, %v2539_v16, %v2541_v44 }
 0x113   : > { %v1449_v53 = vmax.f32 %v1372_v41, 0.0  ;;  %v5138_v55 = vsel %vm1921_vm10, %v2136_v26, 0.0  ;;  %v5142_v56 = vsel %vm5113_vm7, %v2153_v39, 0.0  ;;  %2668 = vrot.lane.b32.xlu1 %v2631_v51, %s6037_s17  ;;  %vm1896_vm13 = vcmp.le.s32.totalorder %v5004_v48, 16  ;;  %vm1959_vm7 = vmand %vm5176_vm15, %vm1947_vm6 }
 0x114   : > { %v2176_v57 = vrot.slane %v2162_v45, %v4768_v7  ;;  %v1636_v58 = vrot.slane %v1622_v46, %v4768_v7  ;;  %v1637_v59 = vcombine.high %v1629_v49, %v1629_v49  ;;  %v2178_v60 = vcombine.low %v1621_v40, %v1629_v49  ;;  %v1376_v63 = vpop.f32.mrf.mxu0  ;;  %2579 = vrot.lane.b32.xlu0 %v2542_v54, %s4627_s25  ;;  %vm5198_vm4 = vmand %vm1886_vm12, %vm1896_vm13 }
 0x115   : > { %v1639_v0 = vcombine.high %v1449_v53, %v1449_v53  ;;  %v1646_v1 = vrot.slane %v1449_v53, %v4768_v7  ;;  %v1377_v6 = vadd.f32 %v4957_v4, %v1376_v63  ;;  %v5157_v8 = vadd.s32 8, %v4963_v2  ;;  %vm5225_vm8 = vmand %vm5198_vm4, %vm1947_vm6 }
 0x116   : > { %v2169_v9 = vrot.slane %v2161_v36, %v4768_v7  ;;  %v1638_v12 = vcombine.high %v1636_v58, %v1636_v58  ;;  %v2179_v13 = vcombine.low %v1637_v59, %v1636_v58  ;;  %v4227_v14 = vpop.f32.mrf.mxu0  ;;  %v5161_v15 = vadd.s32 9, %v4963_v2  ;;  %vm1927_vm12 = vmand %vm5198_vm4, %vm1912_vm5 }
 0x117   : > { %v1653_v17 = vrot.slane %v1639_v0, %v4768_v7  ;;  %v1450_v18 = vmax.f32 %v1377_v6, 0.0  ;;  %v2543_v16 = vrot.slane %v5138_v55, 1  ;;  %v2544_v20 = vrot.slane %v5142_v56, 1 }
 0x118   : > { %v2177_v23 = vcombine.low %v2169_v9, %v2176_v57  ;;  %v2186_v21 = vrot.slane %v2178_v60, %v4768_v7  ;;  %v1654_v24 = vcombine.high %v1646_v1, %v1646_v1  ;;  %v2486_v25 = vsel %vm1956_vm14, %v2160_v34, 0.0  ;;  %v1381_v26 = vpop.f32.mrf.mxu0 }
 0x119   : > { %v2193_v27 = vrot.slane %v2179_v13, %v4768_v7  ;;  %v1655_v28 = vcombine.high %v1653_v17, %v1653_v17  ;;  %v1656_v29 = vcombine.high %v1450_v18, %v1450_v18  ;;  %v1663_v2 = vrot.slane %v1450_v18, %v4768_v7 }
 0x11a   : > { %v2201_v30 = vrot.slane %v1638_v12, %v4768_v7  ;;  %v2545_v31 = vsel %vm2532_vm11, %v2543_v16, %v2544_v20  ;;  %v2546_v32 = vrot.slane %v2486_v25, 1  ;;  %v1382_v33 = vadd.f32 %v4957_v4, %v1381_v26  ;;  %v4230_v42 = vpop.f32.mrf.mxu0 }
 0x11b   : > { %v2203_v35 = vcombine.low %v1653_v17, %v1655_v28  ;;  %v1670_v36 = vrot.slane %v1656_v29, %v4768_v7  ;;  %v1671_v37 = vcombine.high %v1663_v2, %v1663_v2  ;;  %2581 = vrot.lane.b32.xlu0 %v2545_v31, %s4627_s25  ;;  %v2632_v38 = vrot.slane %v5138_v55, 2 }
 0x11c   : > { %v2202_v39 = vcombine.low %v1646_v1, %v1654_v24  ;;  %v2547_v40 = vsel %vm2532_vm11, %v2544_v20, %v2546_v32  ;;  %v1451_v41 = vmax.f32 %v1382_v33, 0.0  ;;  %v2633_v44 = vrot.slane %v5142_v56, 2  ;;  %v1386_v45 = vpop.f32.mrf.mxu0 }
 0x11d   : > { %v2194_v43 = vcombine.low %v2186_v21, %v2193_v27  ;;  %v1672_v46 = vcombine.high %v1670_v36, %v1670_v36  ;;  %2583 = vrot.lane.b32.xlu1 %v2547_v40, %s4627_s25  ;;  %v2635_v49 = vrot.slane %v2486_v25, 2  ;;  %v1387_v51 = vadd.f32 %v4957_v4, %v1386_v45 }
 0x11e   : > { %v2219_v52 = vcombine.low %v1663_v2, %v1671_v37  ;;  %v1673_v53 = vcombine.high %v1451_v41, %v1451_v41  ;;  %v1680_v54 = vrot.slane %v1451_v41, %v4768_v7  ;;  %v2634_v57 = vsel %vm2621_vm3, %v2632_v38, %v2633_v44  ;;  %v4233_v58 = vpop.f32.mrf.mxu0 }
 0x11f   : > { %v2217_v59 = vrot.slane %v2203_v35, %v4768_v7  ;;  %v2220_v60 = vcombine.low %v1670_v36, %v1672_v46  ;;  %2670 = vrot.lane.b32.xlu0 %v2634_v57, %s6037_s17  ;;  %v2636_v0 = vsel %vm2621_vm3, %v2633_v44, %v2635_v49  ;;  %v1452_v1 = vmax.f32 %v1387_v51, 0.0 }
 0x120   : > { %v1687_v6 = vrot.slane %v1673_v53, %v4768_v7  ;;  %v1688_v9 = vcombine.high %v1680_v54, %v1680_v54  ;;  %v2242_v12 = vrot.slane %v1680_v54, %v4768_v7  ;;  %v5206_v13 = vsel %vm1924_vm1, %v2177_v23, 0.0  ;;  %v1391_v14 = vpop.f32.mrf.mxu0 }
 0x121   : > { %v2234_v17 = vrot.slane %v2220_v60, %v4768_v7  ;;  %2672 = vrot.lane.b32.xlu1 %v2636_v0, %s6037_s17  ;;  %v1690_v48 = vcombine.high %v1452_v1, %v1452_v1  ;;  %v1697_v18 = vrot.slane %v1452_v1, %v4768_v7  ;;  %v5213_v16 = vsel %vm5176_vm15, %v2194_v43, 0.0 }
 0x122   : > { %v2210_v20 = vrot.slane %v2202_v39, %v4768_v7  ;;  %v2227_v23 = vrot.slane %v2219_v52, %v4768_v7  ;;  %v5229_v24 = vcombine.low %v1688_v9, %v1687_v6  ;;  %v1689_v25 = vcombine.high %v1687_v6, %v1687_v6  ;;  %v4236_v26 = vpop.f32.mrf.mxu0 }
 0x123   : > { %v1704_v27 = vrot.slane %v1690_v48, %v4768_v7  ;;  %v1705_v28 = vcombine.high %v1697_v18, %v1697_v18  ;;  %v2548_v29 = vrot.slane %v5206_v13, 1  ;;  %v2549_v2 = vrot.slane %v5213_v16, 1 }
 0x124   : > { %v2218_v31 = vcombine.low %v2210_v20, %v2217_v59  ;;  %v5234_v32 = vcombine.low %v1689_v25, %v1697_v18  ;;  %v2489_v33 = vsel %vm1959_vm7, %v2201_v30, 0.0  ;;  %v1392_v42 = vadd.f32 %v4957_v4, %v1391_v14  ;;  %v1396_v34 = vpop.f32.mrf.mxu0 }
 0x125   : > { %vm1887_vm9 = vcmp.ge.s32.totalorder %v5021_v62, 1  ;;  %vm1897_vm10 = vcmp.le.s32.totalorder %v5021_v62, 16  ;;  %v2235_v35 = vcombine.low %v2227_v23, %v2234_v17  ;;  %v5241_v36 = vsel %vm5225_vm8, %v2242_v12, 0.0 }
 0x126   : > { %v2550_v37 = vsel %vm2532_vm11, %v2548_v29, %v2549_v2  ;;  %v2551_v38 = vrot.slane %v2489_v33, 1  ;;  %v2251_v39 = vrot.slane %v5229_v24, %v4768_v7  ;;  %v1453_v30 = vmax.f32 %v1392_v42, 0.0  ;;  %v4239_v44 = vpop.f32.mrf.mxu0  ;;  %vm5292_vm15 = vmand %vm1887_vm9, %vm1897_vm10 }
 0x127   : > { %2585 = vrot.lane.b32.xlu0 %v2550_v37, %s4627_s25  ;;  %v1706_v40 = vcombine.high %v1704_v27, %v1704_v27  ;;  %v2638_v41 = vrot.slane %v5213_v16, 2  ;;  %v2260_v45 = vcombine.low %v1705_v28, %v1704_v27  ;;  %v2637_v46 = vrot.slane %v5206_v13, 2  ;;  %vm5311_vm1 = vmand %vm5292_vm15, %vm1912_vm5 }
 0x128   : > { %v2552_v43 = vsel %vm2532_vm11, %v2549_v2, %v2551_v38  ;;  %v1397_v49 = vadd.f32 %v4957_v4, %v1396_v34  ;;  %v2258_v51 = vrot.slane %v5234_v32, %v4768_v7  ;;  %v1707_v52 = vcombine.high %v1453_v30, %v1453_v30  ;;  %v1401_v57 = vpop.f32.mrf.mxu0 }
 0x129   : > { %2587 = vrot.lane.b32.xlu1 %v2552_v43, %s4627_s25  ;;  %v1714_v53 = vrot.slane %v1453_v30, %v4768_v7  ;;  %v2640_v54 = vrot.slane %v2489_v33, 2  ;;  %v2639_v58 = vsel %vm2621_vm3, %v2637_v46, %v2638_v41  ;;  %v1402_v60 = vadd.f32 %v4957_v4, %v1401_v57 }
 0x12a   : > { %v1454_v59 = vmax.f32 %v1397_v49, 0.0  ;;  %v5261_v0 = vsel %vm1927_vm12, %v2218_v31, 0.0  ;;  %v1721_v1 = vrot.slane %v1707_v52, %v4768_v7  ;;  %v5268_v12 = vsel %vm5198_vm4, %v2235_v35, 0.0  ;;  %v4242_v14 = vpop.f32.mrf.mxu0  ;;  %vm5331_vm4 = vmand %vm5292_vm15, %vm1947_vm6 }
 0x12b   : > { %v2261_v6 = vcombine.low %v1706_v40, %v1714_v53  ;;  %2674 = vrot.lane.b32.xlu0 %v2639_v58, %s6037_s17  ;;  %v2641_v9 = vsel %vm2621_vm3, %v2638_v41, %v2640_v54  ;;  %v1722_v17 = vcombine.high %v1714_v53, %v1714_v53  ;;  %v1455_v20 = vmax.f32 %v1402_v60, 0.0 }
 0x12c   : > { %v1724_v48 = vcombine.high %v1454_v59, %v1454_v59  ;;  %v1731_v18 = vrot.slane %v1454_v59, %v4768_v7  ;;  %v1723_v23 = vcombine.high %v1721_v1, %v1721_v1  ;;  %v2553_v24 = vrot.slane %v5261_v0, 1  ;;  %v1406_v26 = vpop.f32.mrf.mxu0 }
 0x12d   : > { %v2275_v21 = vrot.slane %v2261_v6, %v4768_v7  ;;  %2676 = vrot.lane.b32.xlu1 %v2641_v9, %s6037_s17  ;;  %v2554_v25 = vrot.slane %v5268_v12, 1  ;;  %v1741_v28 = vcombine.high %v1455_v20, %v1455_v20  ;;  %v1748_v29 = vrot.slane %v1455_v20, %v4768_v7 }
 0x12e   : > { %v1738_v63 = vrot.slane %v1724_v48, %v4768_v7  ;;  %v1739_v27 = vcombine.high %v1731_v18, %v1731_v18  ;;  %vm1888_vm13 = vcmp.ge.s32.totalorder %v5028_v11, 1  ;;  %vm1898_vm14 = vcmp.le.s32.totalorder %v5028_v11, 16  ;;  %v4245_v42 = vpop.f32.mrf.mxu0 }
 0x12f   : > { %v2268_v2 = vrot.slane %v2260_v45, %v4768_v7  ;;  %v5280_v31 = vcombine.low %v1721_v1, %v1723_v23  ;;  %v2555_v32 = vsel %vm2532_vm11, %v2553_v24, %v2554_v25  ;;  %v2556_v33 = vrot.slane %v5241_v36, 1  ;;  %vm5361_vm9 = vmand %vm1888_vm13, %vm1898_vm14 }
 0x130   : > { %v1740_v34 = vcombine.high %v1738_v63, %v1738_v63  ;;  %v2285_v35 = vcombine.low %v1731_v18, %v1739_v27  ;;  %v5285_v37 = vrot.slane %v1741_v28, %v4768_v7  ;;  %v1756_v38 = vcombine.high %v1748_v29, %v1748_v29  ;;  %2589 = vrot.lane.b32.xlu0 %v2555_v32, %s4627_s25  ;;  %v1411_v43 = vpop.f32.mrf.mxu0  ;;  %vm1933_vm10 = vmand %vm5361_vm9, %vm1912_vm5 }
 0x131   : > { %v2259_v40 = vcombine.low %v2251_v39, %v2258_v51  ;;  %v2283_v41 = vrot.slane %v1722_v17, %v4768_v7  ;;  %v2557_v44 = vsel %vm2532_vm11, %v2554_v25, %v2556_v33  ;;  %v1407_v45 = vadd.f32 %v4957_v4, %v1406_v26  ;;  %vm5394_vm12 = vmand %vm5361_vm9, %vm1947_vm6 }
 0x132   : > { %v2276_v46 = vcombine.low %v2268_v2, %v2275_v21  ;;  %v2292_v49 = vrot.slane %v5280_v31, %v4768_v7  ;;  %v2302_v52 = vcombine.low %v1748_v29, %v1756_v38  ;;  %2591 = vrot.lane.b32.xlu1 %v2557_v44, %s4627_s25  ;;  %v2642_v62 = vrot.slane %v5261_v0, 2  ;;  %v4248_v58 = vpop.f32.mrf.mxu0 }
 0x133   : > { %v1456_v53 = vmax.f32 %v1407_v45, 0.0  ;;  %v1757_v39 = vcombine.high %v5285_v37, %v5285_v37  ;;  %v2643_v51 = vrot.slane %v5268_v12, 2  ;;  %v2645_v54 = vrot.slane %v5241_v36, 2  ;;  %v5322_v36 = vld [vmem:[%s6030_s3 + $0x8] sm:$0xf] }
 0x134   : > { %v2299_v59 = vrot.slane %v2285_v35, %v4768_v7  ;;  %v2301_v60 = vcombine.low %v1738_v63, %v1740_v34  ;;  %v2324_v1 = vrot.slane %v5285_v37, %v4768_v7  ;;  %v1412_v6 = vadd.f32 %v4957_v4, %v1411_v43  ;;  %v1416_v20 = vpop.f32.mrf.mxu0  ;;  %4292 = vmatprep.subr.msk.mxu1 %vm1256_vm0, %v5322_v36 }
 0x135   : > { %v1758_v9 = vcombine.high %v1456_v53, %v1456_v53  ;;  %v1765_v14 = vrot.slane %v1456_v53, %v4768_v7  ;;  %v2644_v17 = vsel %vm2621_vm3, %v2642_v62, %v2643_v51  ;;  %v2646_v48 = vsel %vm2621_vm3, %v2643_v51, %v2645_v54 }
 0x136   : > { %v2316_v23 = vrot.slane %v2302_v52, %v4768_v7  ;;  %2678 = vrot.lane.b32.xlu0 %v2644_v17, %s6037_s17  ;;  %2680 = vrot.lane.b32.xlu1 %v2646_v48, %s6037_s17  ;;  %v1457_v21 = vmax.f32 %v1412_v6, 0.0  ;;  %v5342_v24 = vsel %vm5311_vm1, %v2259_v40, 0.0  ;;  %v5346_v25 = vsel %vm5292_vm15, %v2276_v46, 0.0  ;;  %v4251_v29 = vpop.f32.mrf.mxu0 }
 0x137   : > { %v1772_v26 = vrot.slane %v1758_v9, %v4768_v7  ;;  %v1773_v63 = vcombine.high %v1765_v14, %v1765_v14  ;;  %v2325_v27 = vcombine.low %v1757_v39, %v1765_v14  ;;  %v2558_v28 = vrot.slane %v5342_v24, 1 }
 0x138   : > { %v1775_v2 = vcombine.high %v1457_v21, %v1457_v21  ;;  %v1782_v31 = vrot.slane %v1457_v21, %v4768_v7  ;;  %v2559_v32 = vrot.slane %v5346_v25, 1  ;;  %v2495_v33 = vsel %vm5331_vm4, %v2283_v41, 0.0  ;;  %v1421_v30 = vpop.f32.mrf.mxu0 }
 0x139   : > { %vm1889_vm7 = vcmp.ge.s32.totalorder %v5084_v50, 1  ;;  %vm1899_vm8 = vcmp.le.s32.totalorder %v5084_v50, 16  ;;  %v2309_v42 = vrot.slane %v2301_v60, %v4768_v7  ;;  %v2326_v34 = vcombine.low %v1773_v63, %v1772_v26 }
 0x13a   : > { %v1774_v35 = vcombine.high %v1772_v26, %v1772_v26  ;;  %v2561_v38 = vrot.slane %v2495_v33, 1  ;;  %v5366_v41 = vrot.slane %v1775_v2, %v4768_v7  ;;  %v1790_v44 = vcombine.high %v1782_v31, %v1782_v31  ;;  %v4254_v53 = vpop.f32.mrf.mxu0  ;;  %vm5424_vm15 = vmand %vm1889_vm7, %vm1899_vm8 }
 0x13b   : > { %v2560_v45 = vsel %vm2532_vm11, %v2558_v28, %v2559_v32  ;;  %v1417_v43 = vadd.f32 %v4957_v4, %v1416_v20  ;;  %v2300_v46 = vcombine.low %v2292_v49, %v2299_v59  ;;  %v2317_v52 = vcombine.low %v2309_v42, %v2316_v23  ;;  %vm1936_vm1 = vmand %vm5424_vm15, %vm1912_vm5 }
 0x13c   : > { %v2340_v62 = vrot.slane %v2326_v34, %v4768_v7  ;;  %2593 = vrot.lane.b32.xlu0 %v2560_v45, %s4627_s25  ;;  %v2562_v11 = vsel %vm2532_vm11, %v2559_v32, %v2561_v38  ;;  %v2333_v39 = vrot.slane %v2325_v27, %v4768_v7  ;;  %v2343_v51 = vcombine.low %v1790_v44, %v5366_v41  ;;  %v1426_v6 = vpop.f32.mrf.mxu0  ;;  %vm1971_vm4 = vmand %vm5424_vm15, %vm1947_vm6 }
 0x13d   : > { %2595 = vrot.lane.b32.xlu1 %v2562_v11, %s4627_s25  ;;  %v1458_v54 = vmax.f32 %v1417_v43, 0.0  ;;  %v2648_v57 = vrot.slane %v5346_v25, 2  ;;  %v2342_v49 = vcombine.low %v1774_v35, %v1782_v31  ;;  %v2647_v58 = vrot.slane %v5342_v24, 2 }
 0x13e   : > { %v2650_v59 = vrot.slane %v2495_v33, 2  ;;  %v1422_v60 = vadd.f32 %v4957_v4, %v1421_v30  ;;  %v2341_v9 = vcombine.low %v2333_v39, %v2340_v62  ;;  %v1791_v14 = vcombine.high %v5366_v41, %v5366_v41  ;;  %v4257_v63 = vpop.f32.mrf.mxu0 }
 0x13f   : > { %v1792_v17 = vcombine.high %v1458_v54, %v1458_v54  ;;  %v1799_v48 = vrot.slane %v1458_v54, %v4768_v7  ;;  %v2649_v18 = vsel %vm2621_vm3, %v2647_v58, %v2648_v57  ;;  %v5388_v21 = vsel %vm1933_vm10, %v2300_v46, 0.0 }
 0x140   : > { %v2651_v20 = vsel %vm2621_vm3, %v2648_v57, %v2650_v59  ;;  %v1459_v23 = vmax.f32 %v1422_v60, 0.0  ;;  %vm1890_vm13 = vcmp.ge.s32.totalorder %v5157_v8, 1  ;;  %vm1900_vm14 = vcmp.le.s32.totalorder %v5157_v8, 16  ;;  %2682 = vrot.lane.b32.xlu0 %v2649_v18, %s6037_s17  ;;  %v1431_v34 = vpop.f32.mrf.mxu0 }
 0x141   : > { %v2357_v27 = vrot.slane %v2343_v51, %v4768_v7  ;;  %v1806_v28 = vrot.slane %v1792_v17, %v4768_v7  ;;  %v1807_v29 = vcombine.high %v1799_v48, %v1799_v48  ;;  %2684 = vrot.lane.b32.xlu1 %v2651_v20, %s6037_s17  ;;  %v5406_v2 = vsel %vm5361_vm9, %v2317_v52, 0.0  ;;  %vm5458_vm7 = vmand %vm1890_vm13, %vm1900_vm14 }
 0x142   : > { %v1809_v31 = vcombine.high %v1459_v23, %v1459_v23  ;;  %v1816_v32 = vrot.slane %v1459_v23, %v4768_v7  ;;  %v2563_v33 = vrot.slane %v5388_v21, 1  ;;  %v2564_v42 = vrot.slane %v5406_v2, 1  ;;  %v4260_v46 = vpop.f32.mrf.mxu0  ;;  %vm5474_vm9 = vmand %vm5458_vm7, %vm1947_vm6 }
 0x143   : > { %v2350_v35 = vrot.slane %v2342_v49, %v4768_v7  ;;  %v1808_v38 = vcombine.high %v1806_v28, %v1806_v28  ;;  %v2498_v30 = vsel %vm5394_vm12, %v2324_v1, 0.0  ;;  %v1427_v40 = vadd.f32 %v4957_v4, %v1426_v6  ;;  %vm1939_vm10 = vmand %vm5458_vm7, %vm1912_vm5 }
 0x144   : > { %v1823_v41 = vrot.slane %v1809_v31, %v4768_v7  ;;  %v1824_v44 = vcombine.high %v1816_v32, %v1816_v32  ;;  %v2565_v45 = vsel %vm2532_vm11, %v2563_v33, %v2564_v42  ;;  %v2566_v43 = vrot.slane %v2498_v30, 1  ;;  %v1436_v57 = vpop.f32.mrf.mxu0 }
 0x145   : > { %v2358_v37 = vcombine.low %v2350_v35, %v2357_v27  ;;  %v2366_v62 = vcombine.low %v1799_v48, %v1807_v29  ;;  %v2367_v1 = vcombine.low %v1806_v28, %v1808_v38  ;;  %2597 = vrot.lane.b32.xlu0 %v2565_v45, %s4627_s25  ;;  %v1460_v11 = vmax.f32 %v1427_v40, 0.0 }
 0x146   : > { %v1825_v53 = vcombine.high %v1823_v41, %v1823_v41  ;;  %v2567_v39 = vsel %vm2532_vm11, %v2564_v42, %v2566_v43  ;;  %v2652_v51 = vrot.slane %v5388_v21, 2  ;;  %v2653_v54 = vrot.slane %v5406_v2, 2  ;;  %v4263_v18 = vpop.f32.mrf.mxu0 }
 0x147   : > { %v2381_v50 = vrot.slane %v2367_v1, %v4768_v7  ;;  %v2383_v49 = vcombine.low %v1816_v32, %v1824_v44  ;;  %2599 = vrot.lane.b32.xlu1 %v2567_v39, %s4627_s25  ;;  %v1826_v58 = vcombine.high %v1460_v11, %v1460_v11  ;;  %v1833_v59 = vrot.slane %v1460_v11, %v4768_v7 }
 0x148   : > { %v2384_v60 = vcombine.low %v1823_v41, %v1825_v53  ;;  %v2654_v6 = vsel %vm2621_vm3, %v2652_v51, %v2653_v54  ;;  %v2655_v17 = vrot.slane %v2498_v30, 2  ;;  %v1432_v48 = vadd.f32 %v4957_v4, %v1431_v34 }
 0x149   : > { %v2365_v20 = vrot.slane %v1791_v14, %v4768_v7  ;;  %v2374_v23 = vrot.slane %v2366_v62, %v4768_v7  ;;  %v1840_v26 = vrot.slane %v1826_v58, %v4768_v7  ;;  %v1841_v63 = vcombine.high %v1833_v59, %v1833_v59  ;;  %2686 = vrot.lane.b32.xlu0 %v2654_v6, %s6037_s17 }
 0x14a   : > { %v2398_v27 = vrot.slane %v2384_v60, %v4768_v7  ;;  %v2656_v28 = vsel %vm2621_vm3, %v2653_v54, %v2655_v17  ;;  %v1461_v29 = vmax.f32 %v1432_v48, 0.0  ;;  %v5447_v31 = vsel %vm1936_vm1, %v2341_v9, 0.0 }
 0x14b   : > { %v2382_v14 = vcombine.low %v2374_v23, %v2381_v50  ;;  %v2391_v32 = vrot.slane %v2383_v49, %v4768_v7  ;;  %2688 = vrot.lane.b32.xlu1 %v2656_v28, %s6037_s17  ;;  %v1842_v9 = vcombine.high %v1840_v26, %v1840_v26  ;;  %v5465_v42 = vsel %vm5424_vm15, %v2358_v37, 0.0 }
 0x14c   : > { %vm1891_vm8 = vcmp.ge.s32.totalorder %v5161_v15, 1  ;;  %v2406_v34 = vrot.slane %v1833_v59, %v4768_v7  ;;  %v2407_v35 = vcombine.low %v1841_v63, %v1840_v26  ;;  %v1843_v38 = vcombine.high %v1461_v29, %v1461_v29 }
 0x14d   : > { %v1850_v30 = vrot.slane %v1461_v29, %v4768_v7  ;;  %v2568_v40 = vrot.slane %v5447_v31, 1  ;;  %v2569_v41 = vrot.slane %v5465_v42, 1  ;;  %v2501_v44 = vsel %vm1971_vm4, %v2365_v20, 0.0 }
 0x14e   : > { %v1437_v45 = vadd.f32 %v4957_v4, %v1436_v57  ;;  %v2399_v43 = vcombine.low %v2391_v32, %v2398_v27  ;;  %v1857_v46 = vrot.slane %v1843_v38, %v4768_v7  ;;  %v2571_v37 = vrot.slane %v2501_v44, 1 }
 0x14f   : > { %v1858_v52 = vcombine.high %v1850_v30, %v1850_v30  ;;  %v2408_v62 = vcombine.low %v1842_v9, %v1850_v30  ;;  %v2570_v1 = vsel %vm2532_vm11, %v2568_v40, %v2569_v41  ;;  %v2658_v53 = vrot.slane %v5465_v42, 2 }
 0x150   : > { %v1462_v11 = vmax.f32 %v1437_v45, 0.0  ;;  %2601 = vrot.lane.b32.xlu0 %v2570_v1, %s4627_s25  ;;  %v2572_v4 = vsel %vm2532_vm11, %v2569_v41, %v2571_v37  ;;  %v1859_v51 = vcombine.high %v1857_v46, %v1857_v46  ;;  %v2657_v54 = vrot.slane %v5447_v31, 2 }
 0x151   : > { %v2424_v39 = vcombine.low %v1858_v52, %v1857_v46  ;;  %v2504_v57 = vsel %vm5474_vm9, %v2406_v34, 0.0  ;;  %2603 = vrot.lane.b32.xlu1 %v2572_v4, %s4627_s25  ;;  %v5495_v49 = vsel %vm1939_vm10, %v2382_v14, 0.0  ;;  %vm1901_vm12 = vcmp.le.s32.totalorder %v5161_v15, 16 }
 0x152   : > { %v1866_v50 = vrot.slane %v1462_v11, %v4768_v7  ;;  %v2415_v58 = vrot.slane %v2407_v35, %v4768_v7  ;;  %v2659_v59 = vsel %vm2621_vm3, %v2657_v54, %v2658_v53  ;;  %v2660_v60 = vrot.slane %v2501_v44, 2  ;;  %vm5518_vm13 = vmand %vm1891_vm8, %vm1901_vm12 }
 0x153   : > { %v5502_v6 = vsel %vm5458_vm7, %v2399_v43, 0.0  ;;  %v2748_v18 = vrot.slane %v5495_v49, 1  ;;  %v2422_v23 = vrot.slane %v2408_v62, %v4768_v7  ;;  %v2432_v26 = vrot.slane %v2424_v39, %v4768_v7  ;;  %vm1977_vm14 = vmand %vm5518_vm13, %vm1947_vm6 }
 0x154   : > { %v1867_v17 = vcombine.high %v1866_v50, %v1866_v50  ;;  %v2425_v48 = vcombine.low %v1859_v51, %v1866_v50  ;;  %v2749_v20 = vrot.slane %v5502_v6, 1  ;;  %2690 = vrot.lane.b32.xlu0 %v2659_v59, %s6037_s17  ;;  %v2661_v63 = vsel %vm2621_vm3, %v2658_v53, %v2660_v60  ;;  %vm1942_vm15 = vmand %vm5518_vm13, %vm1912_vm5 }
 0x155   : > { %v2751_v27 = vrot.slane %v2504_v57, 1  ;;  %2692 = vrot.lane.b32.xlu1 %v2661_v63, %s6037_s17  ;;  %v2760_v9 = vrot.slane %v5502_v6, 2  ;;  %v2423_v34 = vcombine.low %v2415_v58, %v2422_v23  ;;  %v2762_v38 = vrot.slane %v2504_v57, 2 }
 0x156   : > { %v2439_v28 = vrot.slane %v2425_v48, %v4768_v7  ;;  %v2750_v29 = vsel %vm2532_vm11, %v2748_v18, %v2749_v20  ;;  %v2447_v33 = vrot.slane %v1867_v17, %v4768_v7  ;;  %v2759_v15 = vrot.slane %v5495_v49, 2 }
 0x157   : > { %v2752_v14 = vsel %vm2532_vm11, %v2749_v20, %v2751_v27  ;;  %v2623_v30 = vrot.slane %v5041_v22, 2  ;;  %v2763_v19 = vsel %vm2621_vm3, %v2760_v9, %v2762_v38  ;;  %v5539_v40 = vsel %vm1942_vm15, %v2423_v34, 0.0  ;;  %v2743_v20 = vld [vmem:[%s6030_s3] sm:$0xff] }
 0x158   : > { %v2440_v35 = vcombine.low %v2432_v26, %v2439_v28  ;;  %2753 = vrot.lane.b32.xlu0 %v2750_v29, %s4627_s25  ;;  %v2761_v7 = vsel %vm2621_vm3, %v2759_v15, %v2760_v9  ;;  %v2507_v8 = vsel %vm1977_vm14, %v2447_v33, 0.0  ;;  %v2622_v5 = vrot.slane %v5018_v61, 2 }
 0x159   : > { %2755 = vrot.lane.b32.xlu1 %v2752_v14, %s4627_s25  ;;  %v2625_v44 = vrot.slane %v5025_v10, 2  ;;  %v3134_v45 = vrot.slane %v2507_v8, 1  ;;  %v3131_v46 = vrot.slane %v5539_v40, 1  ;;  %v3145_v1 = vrot.slane %v2507_v8, 2 }
 0x15a   : > { %v5543_v41 = vsel %vm5518_vm13, %v2440_v35, 0.0  ;;  %v2624_v43 = vsel %vm2621_vm3, %v2622_v5, %v2623_v30  ;;  %v3142_v10 = vrot.slane %v5539_v40, 2  ;;  %vm2726_vm5 = vcmask 64512  }
 0x15b   : > { %v3132_v52 = vrot.slane %v5543_v41, 1  ;;  %v2626_v37 = vsel %vm2621_vm3, %v2623_v30, %v2625_v44  ;;  %v3143_v53 = vrot.slane %v5543_v41, 2  ;;  %vm2777_vm6 = vcmask 97280  }
 0x15c   : > { %2764 = vrot.lane.b32.xlu0 %v2761_v7, %s6037_s17 }
 0x15d   : > { %2766 = vrot.lane.b32.xlu1 %v2763_v19, %s6037_s17  ;;  %v3135_v62 = vsel %vm2532_vm11, %v3132_v52, %v3134_v45  ;;  %v3133_v11 = vsel %vm2532_vm11, %v3131_v46, %v3132_v52  ;;  %v3146_v39 = vsel %vm2621_vm3, %v3143_v53, %v3145_v1  ;;  %v3144_v4 = vsel %vm2621_vm3, %v3142_v10, %v3143_v53 }
 0x160   : > { %2662 = vrot.lane.b32.xlu0 %v2624_v43, %s6037_s17 }
 0x161   : > { %2664 = vrot.lane.b32.xlu1 %v2626_v37, %s6037_s17 }
 0x164   : > { %3136 = vrot.lane.b32.xlu0 %v3133_v11, %s4627_s25 }
 0x165   : > { %3138 = vrot.lane.b32.xlu1 %v3135_v62, %s4627_s25  ;;  %s337_s25 = sand.u32 1, %s4598_s10  }
 0x166   : > { %s5975_s24 = scalar_lea.sflag [#allocation3], %s337_s25 }
 0x168   : > { %3147 = vrot.lane.b32.xlu0 %v3144_v4, %s6037_s17 }
 0x169   : > { %3149 = vrot.lane.b32.xlu1 %v3146_v39, %s6037_s17  ;;  %s4629_s17 = smov [#allocation2]  }
 0x16a   : > { %s4534_s0 = sshll.u32 %s4629_s17, 4  ;;  %s4535_s0 = int_to_ptr.vmem [resolvable:$false] %s4534_s0 }
 0x16b   : > { %s4536_s1 = scalar_lea.vmem %s4535_s0, 4096 }
 0x179   : > { %v5564_v51 = vpop.permute.xlu0 %2573  ;;  %v5566_v54 = vpop.permute.xlu1 %2575 }
 0x181   : > { %v2667_v57 = vpop.permute.xlu1 %2666 }
 0x182   : > { %v2578_v50 = vpop.permute.xlu0 %2577 }
 0x183   : > { %v2712_v58 = vsel %vm1209_vm2, %v5073_v47, %v2578_v50  ;;  %v5590_v47 = vld [vmem:[%s6030_s3 + $0x28] sm:$0xf] }
 0x184   : > { %v5571_v59 = vsel %vm2726_vm5, %v2712_v58, %v2667_v57 }
 0x185   : > { %4268 = vmatprep.mubr.msk.f32.mxu1 %vm2777_vm6, %v5571_v59  ;;  %v2669_v60 = vpop.permute.xlu1 %2668 }
 0x186   : > { %v2580_v17 = vpop.permute.xlu0 %2579 }
 0x187   : > { %v2713_v48 = vsel %vm1209_vm2, %v5096_v3, %v2580_v17 }
 0x188   : > { %v5578_v18 = vsel %vm2726_vm5, %v2713_v48, %v2669_v60 }
 0x189   : > { %4269 = vmatmul.mubr.msk.f32.vlgmr.msra.gmra.mxu1 %vm2777_vm6, %v5578_v18 }
 0x18a   : > { %4293 = vmatpush3.msk.msra.mxu1 %vm1256_vm0, %v5322_v36 }
 0x18b   : > { %4294 = vmatprep.subr.mxu1 %v2743_v20 }
 0x18c   : > { %4295 = vmatpush3.msra.mxu1 %v2743_v20 }
 0x18d   : > { %v2582_v3 = vpop.permute.xlu0 %2581  ;;  %4320 = vmatprep.subr.msk.mxu1 %vm1256_vm0, %v5590_v47 }
 0x18e   : > { %v2714_v26 = vsel %vm1209_vm2, %v5138_v55, %v2582_v3 }
 0x18f   : > { %v2584_v23 = vpop.permute.xlu1 %2583 }
 0x190   : > { %v2715_v36 = vsel %vm1209_vm2, %v5142_v56, %v2584_v23 }
 0x191   : > { %v2671_v63 = vpop.permute.xlu0 %2670 }
 0x192   : > { %v5597_v27 = vsel %vm2726_vm5, %v2714_v26, %v2671_v63  ;;  %v2710_v63 = vsel %vm1209_vm2, %v5018_v61, %v5564_v51  ;;  %v3369_v61 = vld [vmem:[%s6032_s5] sm:$0xf] }
 0x193   : > { %v2673_v28 = vpop.permute.xlu1 %2672  ;;  %4271 = vmatprep.mubr.msk.f32.mxu1 %vm2777_vm6, %v5597_v27  ;;  %4348 = vmatprep.subr.msk.mxu0 %vm1256_vm0, %v3369_v61 }
 0x194   : > { %v5604_v29 = vsel %vm2726_vm5, %v2715_v36, %v2673_v28  ;;  %4349 = vmatpush3.msk.msra.mxu0 %vm1256_vm0, %v3369_v61  ;;  %v4519_v61 = vld [vmem:[%s4770_s28 + $0xc0] sm:$0xff] }
 0x195   : > { %4272 = vmatmul.mubr.msk.f32.gmra.mxu1 %vm2777_vm6, %v5604_v29 }
 0x199   : > { %v2586_v14 = vpop.permute.xlu0 %2585 }
 0x19a   : > { %v2716_v55 = vsel %vm1209_vm2, %v5206_v13, %v2586_v14 }
 0x19b   : > { %v2588_v32 = vpop.permute.xlu1 %2587 }
 0x19c   : > { %v2717_v56 = vsel %vm1209_vm2, %v5213_v16, %v2588_v32  ;;  %v4017_v32 = vld [vmem:[%s6030_s3 + $0x20] sm:$0xff] }
 0x19d   : > { %v2675_v33 = vpop.permute.xlu0 %2674 }
 0x19e   : > { %v5611_v9 = vsel %vm2726_vm5, %v2716_v55, %v2675_v33  ;;  %v4498_v55 = vld [vmem:[%s4770_s28 + $0x18] sm:$0xff] }
 0x19f   : > { %v2677_v34 = vpop.permute.xlu1 %2676  ;;  %4274 = vmatprep.mubr.msk.f32.mxu1 %vm2777_vm6, %v5611_v9  ;;  %v3573_v33 = vrot.slane %v4498_v55, 1 }
 0x1a0   : > { %v5618_v35 = vsel %vm2726_vm5, %v2717_v56, %v2677_v34  ;;  %v4500_v34 = vld [vmem:[%s4770_s28 + $0x28] sm:$0x3] }
 0x1a1   : > { %4275 = vmatmul.mubr.msk.f32.gmra.mxu1 %vm2777_vm6, %v5618_v35 }
 0x1a2   : > { %v2590_v38 = vpop.permute.xlu0 %2589 }
 0x1a3   : > { %v2718_v13 = vsel %vm1209_vm2, %v5261_v0, %v2590_v38 }
 0x1a4   : > { %v2592_v15 = vpop.permute.xlu1 %2591 }
 0x1a5   : > { %v2719_v7 = vsel %vm1209_vm2, %v5268_v12, %v2592_v15  ;;  %v4501_v15 = vld [vmem:[%s4770_s28 + $0x30] sm:$0xff] }
 0x1a8   : > { %v2679_v30 = vpop.permute.xlu0 %2678  ;;  %v2681_v16 = vpop.permute.xlu1 %2680 }
 0x1a9   : > { %v5627_v8 = vsel %vm2726_vm5, %v2718_v13, %v2679_v30  ;;  %v5630_v19 = vsel %vm2726_vm5, %v2719_v7, %v2681_v16  ;;  %v3578_v13 = vrot.slane %v4501_v15, 1  ;;  %v4502_v7 = vld [vmem:[%s4770_s28 + $0x38] sm:$0xff] }
 0x1aa   : > { %4277 = vmatprep.mubr.msk.f32.mxu1 %vm2777_vm6, %v5627_v8  ;;  %v3579_v30 = vrot.slane %v4502_v7, 1 }
 0x1ab   : > { %4278 = vmatmul.mubr.msk.f32.gmra.mxu1 %vm2777_vm6, %v5630_v19 }
 0x1ac   : > { %v3580_v16 = vsel %vm2532_vm11, %v3578_v13, %v3579_v30 }
 0x1ae   : > { %v2594_v5 = vpop.permute.xlu0 %2593 }
 0x1af   : > { %v2596_v44 = vpop.permute.xlu1 %2595  ;;  %v2720_v0 = vsel %vm1209_vm2, %v5342_v24, %v2594_v5 }
 0x1b0   : > { %v2721_v12 = vsel %vm1209_vm2, %v5346_v25, %v2596_v44  ;;  %v4504_v44 = vld [vmem:[%s4770_s28 + $0x48] sm:$0xff] }
 0x1b2   : > { %v2683_v45 = vpop.permute.xlu0 %2682 }
 0x1b3   : > { %v2685_v43 = vpop.permute.xlu1 %2684  ;;  %v5641_v46 = vsel %vm2726_vm5, %v2720_v0, %v2683_v45  ;;  %v3583_v0 = vrot.slane %v4504_v44, 1 }
 0x1b4   : > { %v5644_v52 = vsel %vm2726_vm5, %v2721_v12, %v2685_v43  ;;  %4280 = vmatprep.mubr.msk.f32.mxu1 %vm2777_vm6, %v5641_v46  ;;  %v4505_v12 = vld [vmem:[%s4770_s28 + $0x50] sm:$0xff] }
 0x1b5   : > { %4281 = vmatmul.mubr.msk.f32.gmra.mxu1 %vm2777_vm6, %v5644_v52  ;;  %v3584_v45 = vrot.slane %v4505_v12, 1 }
 0x1b7   : > { %v2598_v37 = vpop.permute.xlu0 %2597  ;;  %v3585_v43 = vsel %vm2532_vm11, %v3583_v0, %v3584_v45 }
 0x1b8   : > { %v2722_v24 = vsel %vm1209_vm2, %v5388_v21, %v2598_v37 }
 0x1b9   : > { %v2600_v62 = vpop.permute.xlu1 %2599 }
 0x1ba   : > { %v2723_v11 = vsel %vm1209_vm2, %v5406_v2, %v2600_v62  ;;  %v4507_v62 = vld [vmem:[%s4770_s28 + $0x60] sm:$0xff] }
 0x1bb   : > { %v2687_v25 = vpop.permute.xlu0 %2686 }
 0x1bc   : > { %v5653_v1 = vsel %vm2726_vm5, %v2722_v24, %v2687_v25  ;;  %v3588_v24 = vrot.slane %v4507_v62, 1  ;;  %v4508_v25 = vld [vmem:[%s4770_s28 + $0x68] sm:$0xff] }
 0x1bd   : > { %v2689_v10 = vpop.permute.xlu1 %2688  ;;  %4283 = vmatprep.mubr.msk.f32.mxu1 %vm2777_vm6, %v5653_v1 }
 0x1be   : > { %v2740_v53 = vsel %vm2726_vm5, %v2723_v11, %v2689_v10  ;;  %v4509_v10 = vld [vmem:[%s4770_s28 + $0x70] sm:$0x3] }
 0x1bf   : > { %4284 = vmatmul.mubr.msk.f32.gmra.mxu1 %vm2777_vm6, %v2740_v53 }
 0x1c2   : > { %v2602_v39 = vpop.permute.xlu0 %2601 }
 0x1c3   : > { %v2604_v4 = vpop.permute.xlu1 %2603  ;;  %v2724_v21 = vsel %vm1209_vm2, %v5447_v31, %v2602_v39 }
 0x1c4   : > { %v2725_v50 = vsel %vm1209_vm2, %v5465_v42, %v2604_v4  ;;  %v4510_v4 = vld [vmem:[%s4770_s28 + $0x78] sm:$0xff] }
 0x1c6   : > { %v2691_v57 = vpop.permute.xlu0 %2690 }
 0x1c7   : > { %v2741_v58 = vsel %vm2726_vm5, %v2724_v21, %v2691_v57  ;;  %v2693_v2 = vpop.permute.xlu1 %2692  ;;  %v3593_v21 = vrot.slane %v4510_v4, 1  ;;  %v4511_v57 = vld [vmem:[%s4770_s28 + $0x80] sm:$0xff] }
 0x1c8   : > { %v2742_v60 = vsel %vm2726_vm5, %v2725_v50, %v2693_v2  ;;  %4286 = vmatprep.mubr.msk.f32.mxu1 %vm2777_vm6, %v2741_v58  ;;  %v3594_v50 = vrot.slane %v4511_v57, 1  ;;  %v4512_v2 = vld [vmem:[%s4770_s28 + $0x88] sm:$0x3] }
 0x1c9   : > { %4287 = vmatmul.mubr.msk.f32.gmra.mxu1 %vm2777_vm6, %v2742_v60 }
 0x1ca   : > { %v2754_v17 = vpop.permute.xlu0 %2753 }
 0x1cb   : > { %v2756_v48 = vpop.permute.xlu1 %2755  ;;  %v2770_v20 = vsel %vm1209_vm2, %v5495_v49, %v2754_v17  ;;  %v2711_v49 = vsel %vm1209_vm2, %v5041_v22, %v5566_v54 }
 0x1cc   : > { %v2771_v31 = vsel %vm1209_vm2, %v5502_v6, %v2756_v48  ;;  %v4513_v48 = vld [vmem:[%s4770_s28 + $0x90] sm:$0xff] }
 0x1ce   : > { %v2765_v3 = vpop.permute.xlu0 %2764 }
 0x1cf   : > { %v2772_v42 = vsel %vm2726_vm5, %v2770_v20, %v2765_v3  ;;  %v2767_v23 = vpop.permute.xlu1 %2766  ;;  %v3598_v20 = vrot.slane %v4513_v48, 1  ;;  %v4514_v3 = vld [vmem:[%s4770_s28 + $0x98] sm:$0xff] }
 0x1d0   : > { %v2773_v26 = vsel %vm2726_vm5, %v2771_v31, %v2767_v23  ;;  %4289 = vmatprep.mubr.msk.f32.mxu1 %vm2777_vm6, %v2772_v42  ;;  %v3599_v31 = vrot.slane %v4514_v3, 1  ;;  %v4515_v23 = vld [vmem:[%s4770_s28 + $0xa0] sm:$0x3] }
 0x1d1   : > { %4290 = vmatmul.mubr.msk.f32.gmra.mxu1 %vm2777_vm6, %v2773_v26 }
 0x1d2   : > { %v2663_v36 = vpop.permute.xlu0 %2662 }
 0x1d3   : > { %v2727_v6 = vsel %vm2726_vm5, %v2710_v63, %v2663_v36  ;;  %v2665_v28 = vpop.permute.xlu1 %2664  ;;  %v4516_v36 = vld [vmem:[%s4770_s28 + $0xa8] sm:$0xff] }
 0x1d4   : > { %v2728_v14 = vsel %vm2726_vm5, %v2711_v49, %v2665_v28  ;;  %4296 = vmatprep.mubr.msk.f32.mxu1 %vm2777_vm6, %v2727_v6  ;;  %v3603_v49 = vrot.slane %v4516_v36, 1  ;;  %v4517_v6 = vld [vmem:[%s4770_s28 + $0xb0] sm:$0xff] }
 0x1d5   : > { %4297 = vmatmul.mubr.msk.f32.vlgmr.msra.gmra.mxu1 %vm2777_vm6, %v2728_v14  ;;  %v3604_v28 = vrot.slane %v4517_v6, 1  ;;  %v4518_v14 = vld [vmem:[%s4770_s28 + $0xb8] sm:$0x3] }
 0x1d6   : > { %4321 = vmatpush3.msk.msra.mxu1 %vm1256_vm0, %v5590_v47  ;;  %4299 = vmatprep.mubr.msk.f32.mxu1 %vm2777_vm6, %v5571_v59  ;;  %v3137_v22 = vpop.permute.xlu0 %3136 }
 0x1d7   : > { %4322 = vmatprep.subr.mxu1 %v4017_v32  ;;  %v3139_v51 = vpop.permute.xlu1 %3138  ;;  %v3153_v59 = vsel %vm1209_vm2, %v5539_v40, %v3137_v22  ;;  %v3613_v40 = vld [vmem:[%s6034_s7] sm:$0xf]  ;;  %v3608_v22 = vrot.slane %v4519_v61, 1 }
 0x1d8   : > { %4323 = vmatpush3.msra.mxu1 %v4017_v32  ;;  %v3606_v32 = vrot.slane %v4518_v14, 1 }
 0x1d9   : > { %4300 = vmatmul.mubr.msk.f32.gmra.mxu1 %vm2777_vm6, %v5578_v18  ;;  %4374 = vmatprep.subr.msk.mxu1 %vm1256_vm0, %v3613_v40 }
 0x1da   : > { %4302 = vmatprep.mubr.msk.f32.mxu1 %vm2777_vm6, %v5597_v27  ;;  %v3148_v54 = vpop.permute.xlu0 %3147 }
 0x1db   : > { %v3155_v18 = vsel %vm2726_vm5, %v3153_v59, %v3148_v54  ;;  %v3150_v47 = vpop.permute.xlu1 %3149  ;;  %v3605_v59 = vsel %vm2532_vm11, %v3603_v49, %v3604_v28 }
 0x1dd   : > { %4303 = vmatmul.mubr.msk.f32.gmra.mxu1 %vm2777_vm6, %v5604_v29 }
 0x1de   : > { %4305 = vmatprep.mubr.msk.f32.mxu1 %vm2777_vm6, %v5611_v9 }
 0x1e1   : > { %4306 = vmatmul.mubr.msk.f32.gmra.mxu1 %vm2777_vm6, %v5618_v35 }
 0x1e2   : > { %4308 = vmatprep.mubr.msk.f32.mxu1 %vm2777_vm6, %v5627_v8 }
 0x1e5   : > { %4309 = vmatmul.mubr.msk.f32.gmra.mxu1 %vm2777_vm6, %v5630_v19 }
 0x1e6   : > { %4311 = vmatprep.mubr.msk.f32.mxu1 %vm2777_vm6, %v5641_v46 }
 0x1e9   : > { %4312 = vmatmul.mubr.msk.f32.gmra.mxu1 %vm2777_vm6, %v5644_v52 }
 0x1ea   : > { %4314 = vmatprep.mubr.msk.f32.mxu1 %vm2777_vm6, %v5653_v1 }
 0x1ed   : > { %4315 = vmatmul.mubr.msk.f32.gmra.mxu1 %vm2777_vm6, %v2740_v53 }
 0x1ee   : > { %4317 = vmatprep.mubr.msk.f32.mxu1 %vm2777_vm6, %v2741_v58 }
 0x1f1   : > { %4318 = vmatmul.mubr.msk.f32.gmra.mxu1 %vm2777_vm6, %v2742_v60 }
 0x1f2   : > { %4324 = vmatprep.mubr.msk.f32.mxu1 %vm2777_vm6, %v5597_v27  ;;  %v3154_v27 = vsel %vm1209_vm2, %v5543_v41, %v3139_v51  ;;  %v4520_v51 = vld [vmem:[%s4770_s28 + $0xc8] sm:$0xff] }
 0x1f3   : > { %v3609_v54 = vrot.slane %v4520_v51, 1 }
 0x1f5   : > { %4325 = vmatmul.mubr.msk.f32.vlgmr.msra.gmra.mxu1 %vm2777_vm6, %v5604_v29  ;;  %v3156_v29 = vsel %vm2726_vm5, %v3154_v27, %v3150_v47  ;;  %v4521_v47 = vld [vmem:[%s4770_s28 + $0xd0] sm:$0x3] }
 0x1f6   : > { %4327 = vmatprep.mubr.msk.f32.mxu1 %vm2777_vm6, %v5611_v9  ;;  %4375 = vmatpush3.msk.msra.mxu1 %vm1256_vm0, %v3613_v40  ;;  %v4499_v9 = vld [vmem:[%s4770_s28 + $0x20] sm:$0xff]  ;;  %v3611_v27 = vrot.slane %v4521_v47, 1  ;;  %vm3833_vm0 = vcmask 130048  }
 0x1f7   : > { %v3574_v56 = vrot.slane %v4499_v9, 1 }
 0x1f8   : > { %v3612_v40 = vsel %vm2532_vm11, %v3609_v54, %v3611_v27 }
 0x1f9   : > { %4328 = vmatmul.mubr.msk.f32.gmra.mxu1 %vm2777_vm6, %v5618_v35  ;;  %v3575_v41 = vsel %vm2532_vm11, %v3573_v33, %v3574_v56  ;;  %v3576_v35 = vrot.slane %v4500_v34, 1 }
 0x1fa   : > { %4330 = vmatprep.mubr.msk.f32.mxu1 %vm2777_vm6, %v5627_v8  ;;  %v4503_v8 = vld [vmem:[%s4770_s28 + $0x40] sm:$0x3] }
 0x1fb   : > { %v3577_v38 = vsel %vm2532_vm11, %v3574_v56, %v3576_v35 }
 0x1fd   : > { %4331 = vmatmul.mubr.msk.f32.gmra.mxu1 %vm2777_vm6, %v5630_v19  ;;  %v3581_v19 = vrot.slane %v4503_v8, 1 }
 0x1fe   : > { %4333 = vmatprep.mubr.msk.f32.mxu1 %vm2777_vm6, %v5641_v46  ;;  %v4506_v46 = vld [vmem:[%s4770_s28 + $0x58] sm:$0x3]  ;;  %s3950_s28 = sshll.u32 %s337_s25, 7 }
 0x1ff   : > { %v3582_v5 = vsel %vm2532_vm11, %v3579_v30, %v3581_v19  ;;  %s5904_s18 = scalar_lea.vmem [#allocation2], %s3950_s28 }
 0x200   : > { %s3867_s13 = sshll.u32 %s5904_s18, 4  ;;  %s5962_s13 = int_to_ptr.vmem [resolvable:$true] %s3867_s13 }
 0x201   : > { %4334 = vmatmul.mubr.msk.f32.gmra.mxu1 %vm2777_vm6, %v5644_v52  ;;  %v3586_v52 = vrot.slane %v4506_v46, 1  ;;  %s4530_s12 = scalar_lea.vmem %s5962_s13, 2048  ;;  %p4537_p2 = scmp.lt.s32.totalorder %s5962_s13, %s4535_s0 }
 0x202   : > { %4336 = vmatprep.mubr.msk.f32.mxu1 %vm2777_vm6, %v5653_v1  ;;  %v3589_v1 = vrot.slane %v4508_v25, 1  ;;  %p4531_p13 = scmp.ne.s32.totalorder %s5962_s13, %s4530_s12  ;;  %p4538_p4 = scmp.lt.s32.totalorder %s4536_s1, %s4530_s12 }
 0x203   : > { %v3587_v37 = vsel %vm2532_vm11, %v3584_v45, %v3586_v52 }
 0x204   : > { %v3590_v11 = vsel %vm2532_vm11, %v3588_v24, %v3589_v1  ;;  %p4532_p0 = pnand %p4531_p13, %p4732_p3  ;;  %p4539_p5 = por %p4538_p4, %p4537_p2 }
 0x205   : > { %4337 = vmatmul.mubr.msk.f32.gmra.mxu1 %vm2777_vm6, %v2740_v53  ;;  %v3591_v53 = vrot.slane %v4509_v10, 1 }
 0x206   : > { %4339 = vmatprep.mubr.msk.f32.mxu1 %vm2777_vm6, %v2741_v58  ;;  %v3595_v58 = vsel %vm2532_vm11, %v3593_v21, %v3594_v50  ;;  %p4533_p1 = pneg %p4532_p0 }
 0x207   : > { %v3592_v39 = vsel %vm2532_vm11, %v3589_v1, %v3591_v53 }
 0x208   : > { %p4540_p6 = pnand %p4539_p5, %p4533_p1 }
 0x209   : > { %4340 = vmatmul.mubr.msk.f32.gmra.mxu1 %vm2777_vm6, %v2742_v60  ;;  %v3596_v60 = vrot.slane %v4512_v2, 1 }
 0x20a   : > { %4342 = vmatprep.mubr.msk.f32.mxu1 %vm2777_vm6, %v2772_v42  ;;  %v3600_v42 = vsel %vm2532_vm11, %v3598_v20, %v3599_v31 }
 0x20b   : > { %v3597_v17 = vsel %vm2532_vm11, %v3594_v50, %v3596_v60 }
 0x20d   : > { %4343 = vmatmul.mubr.msk.f32.gmra.mxu1 %vm2777_vm6, %v2773_v26  ;;  %v3601_v26 = vrot.slane %v4515_v23, 1 }
 0x20e   : > { %4345 = vmatprep.mubr.msk.f32.mxu1 %vm2777_vm6, %v3155_v18  ;;  %v3607_v18 = vsel %vm2532_vm11, %v3604_v28, %v3606_v32 }
 0x20f   : > { %v3602_v63 = vsel %vm2532_vm11, %v3599_v31, %v3601_v26 }
 0x211   : > { %4346 = vmatmul.mubr.msk.f32.gmra.mxu1 %vm2777_vm6, %v3156_v29  ;;  %v3610_v29 = vsel %vm2532_vm11, %v3608_v22, %v3609_v54 }
 0x212   : > { %4376 = vmatprep.mubr.msk.f32.mxu1 %vm1209_vm2, %v3575_v41 }
 0x215   : > { %4377 = vmatmul.mubr.msk.f32.vlgmr.msra.gmra.mxu1 %vm1209_vm2, %v3577_v38 }
 0x216   : > { %4379 = vmatprep.mubr.msk.f32.mxu1 %vm1209_vm2, %v3580_v16 }
 0x219   : > { %4380 = vmatmul.mubr.msk.f32.gmra.mxu1 %vm1209_vm2, %v3582_v5 }
 0x21a   : > { %4382 = vmatprep.mubr.msk.f32.mxu1 %vm1209_vm2, %v3585_v43 }
 0x21d   : > { %4383 = vmatmul.mubr.msk.f32.gmra.mxu1 %vm1209_vm2, %v3587_v37 }
 0x21e   : > { %4385 = vmatprep.mubr.msk.f32.mxu1 %vm1209_vm2, %v3590_v11 }
 0x221   : > { %4386 = vmatmul.mubr.msk.f32.gmra.mxu1 %vm1209_vm2, %v3592_v39 }
 0x222   : > { %4388 = vmatprep.mubr.msk.f32.mxu1 %vm1209_vm2, %v3595_v58  ;;  %v5839_v58 = vld [vmem:[%s6031_s4] ss:$0 sm:$0xff] }
 0x225   : > { %4389 = vmatmul.mubr.msk.f32.gmra.mxu1 %vm1209_vm2, %v3597_v17 }
 0x226   : > { %4391 = vmatprep.mubr.msk.f32.mxu1 %vm1209_vm2, %v3600_v42 }
 0x229   : > { %4392 = vmatmul.mubr.msk.f32.gmra.mxu1 %vm1209_vm2, %v3602_v63 }
 0x22a   : > { %4394 = vmatprep.mubr.msk.f32.mxu1 %vm1209_vm2, %v3605_v59 }
 0x22d   : > { %4395 = vmatmul.mubr.msk.f32.gmra.mxu1 %vm1209_vm2, %v3607_v18 }
 0x22e   : > { %4397 = vmatprep.mubr.msk.f32.mxu1 %vm1209_vm2, %v3610_v29 }
 0x231   : > { %4398 = vmatmul.mubr.msk.f32.gmra.mxu1 %vm1209_vm2, %v3612_v40 }
 0x249   : > { %v4270_v55 = vpop.f32.mrf.mxu1 }
 0x24b   : > { %v2895_v33 = vpop.f32.mrf.mxu1 }
 0x255   : > { %v4273_v9 = vpop.f32.mrf.mxu1 }
 0x257   : > { %v2905_v56 = vpop.f32.mrf.mxu1 }
 0x261   : > { %v4276_v41 = vpop.f32.mrf.mxu1 }
 0x263   : > { %v2915_v34 = vpop.f32.mrf.mxu1 }
 0x26b   : > { %v4279_v35 = vpop.f32.mrf.mxu1 }
 0x26d   : > { %v2925_v38 = vpop.f32.mrf.mxu1 }
 0x275   : > { %v4282_v15 = vpop.f32.mrf.mxu1 }
 0x277   : > { %v5814_v13 = vpop.f32.mrf.mxu1 }
 0x27f   : > { %v5816_v7 = vpop.f32.mrf.mxu1 }
 0x281   : > { %v5818_v30 = vpop.f32.mrf.mxu1 }
 0x289   : > { %v5820_v16 = vpop.f32.mrf.mxu1 }
 0x28b   : > { %v5822_v8 = vpop.f32.mrf.mxu1 }
 0x291   : > { %v5824_v19 = vpop.f32.mrf.mxu1 }
 0x293   : > { %v5826_v5 = vpop.f32.mrf.mxu1 }
 0x295   : > { %v4298_v44 = vpop.f32.mrf.mxu1 }
 0x296   : > { %v3055_v4 = vadd.f32 %v4298_v44, %v4270_v55 }
 0x297   : > { %v3049_v0 = vpop.f32.mrf.mxu1 }
 0x298   : > { %v3050_v57 = vadd.f32 %v3049_v0, %v2895_v33 }
 0x299   : > { %v4301_v12 = vpop.f32.mrf.mxu1 }
 0x29a   : > { %v3065_v60 = vadd.f32 %v4301_v12, %v4273_v9 }
 0x29b   : > { %v3059_v45 = vpop.f32.mrf.mxu1 }
 0x29c   : > { %v3060_v3 = vadd.f32 %v3059_v45, %v2905_v56 }
 0x29d   : > { %v4304_v43 = vpop.f32.mrf.mxu1 }
 0x29e   : > { %v3075_v26 = vadd.f32 %v4304_v43, %v4276_v41 }
 0x29f   : > { %v3069_v46 = vpop.f32.mrf.mxu1 }
 0x2a0   : > { %v3070_v14 = vadd.f32 %v3069_v46, %v2915_v34 }
 0x2a1   : > { %v4307_v52 = vpop.f32.mrf.mxu1 }
 0x2a2   : > { %v3085_v51 = vadd.f32 %v4307_v52, %v4279_v35 }
 0x2a3   : > { %v3079_v37 = vpop.f32.mrf.mxu1 }
 0x2a4   : > { %v3080_v29 = vadd.f32 %v3079_v37, %v2925_v38 }
 0x2a5   : > { %v4310_v62 = vpop.f32.mrf.mxu1 }
 0x2a6   : > { %v3095_v9 = vadd.f32 %v4310_v62, %v4282_v15 }
 0x2a7   : > { %v3089_v24 = vpop.f32.mrf.mxu1 }
 0x2a8   : > { %v3090_v0 = vadd.f32 %v3089_v24, %v5814_v13 }
 0x2a9   : > { %v4313_v25 = vpop.f32.mrf.mxu1 }
 0x2aa   : > { %v3105_v43 = vadd.f32 %v4313_v25, %v5816_v7 }
 0x2ab   : > { %v3099_v1 = vpop.f32.mrf.mxu1 }
 0x2ad   : > { %v5828_v11 = vpop.f32.mrf.mxu1 }
 0x2af   : > { %v5830_v10 = vpop.f32.mrf.mxu1 }
 0x2b1   : > { %v5832_v53 = vpop.f32.mrf.mxu1 }
 0x2b3   : > { %v5834_v39 = vpop.f32.mrf.mxu1 }
 0x2b5   : > { %v4326_v21 = vpop.f32.mrf.mxu1 }
 0x2b6   : > { %v3315_v50 = vadd.f32 %v4326_v21, %v3055_v4  ;;  %v3100_v4 = vadd.f32 %v3099_v1, %v5818_v30  ;;  %v3110_v30 = vadd.f32 %v5830_v10, %v5822_v8  ;;  %v3120_v8 = vadd.f32 %v5834_v39, %v5826_v5 }
 0x2b7   : > { %v3235_v2 = vpop.f32.mrf.mxu1 }
 0x2b8   : > { %v3314_v17 = vadd.f32 %v3235_v2, %v3050_v57  ;;  %v3338_v48 = vadd.f32 %v5839_v58, %v3315_v50  ;;  %v3115_v57 = vadd.f32 %v5828_v11, %v5820_v16  ;;  %v3125_v16 = vadd.f32 %v5832_v53, %v5824_v19 }
 0x2b9   : > { %v4329_v20 = vpop.f32.mrf.mxu1 }
 0x2ba   : > { %v3337_v31 = vadd.f32 %v5839_v58, %v3314_v17  ;;  %v3317_v42 = vadd.f32 %v4329_v20, %v3065_v60  ;;  %v3354_v49 = vmax.f32 %v3338_v48, 0.0 }
 0x2bb   : > { %v3245_v23 = vpop.f32.mrf.mxu1 }
 0x2bc   : > { %v3353_v63 = vmax.f32 %v3337_v31, 0.0  ;;  %v3316_v36 = vadd.f32 %v3245_v23, %v3060_v3  ;;  %v3340_v6 = vadd.f32 %v5839_v58, %v3317_v42 }
 0x2bd   : > { %v4332_v28 = vpop.f32.mrf.mxu1 }
 0x2be   : > { %v3339_v32 = vadd.f32 %v5839_v58, %v3316_v36  ;;  %v3319_v61 = vadd.f32 %v4332_v28, %v3075_v26  ;;  %4350 = vmatprep.mubr.msk.f32.mxu0 %vm1209_vm2, %v3353_v63  ;;  %v3356_v18 = vmax.f32 %v3340_v6, 0.0 }
 0x2bf   : > { %v3255_v22 = vpop.f32.mrf.mxu1  ;;  %4351 = vmatmul.mubr.msk.f32.vlgmr.msra.gmra.mxu0 %vm1209_vm2, %v3354_v49 }
 0x2c0   : > { %v3355_v54 = vmax.f32 %v3339_v32, 0.0  ;;  %v3318_v59 = vadd.f32 %v3255_v22, %v3070_v14  ;;  %v3342_v47 = vadd.f32 %v5839_v58, %v3319_v61 }
 0x2c1   : > { %v4335_v27 = vpop.f32.mrf.mxu1 }
 0x2c2   : > { %v3341_v40 = vadd.f32 %v5839_v58, %v3318_v59  ;;  %v3321_v55 = vadd.f32 %v4335_v27, %v3085_v51  ;;  %4353 = vmatprep.mubr.msk.f32.mxu0 %vm1209_vm2, %v3355_v54  ;;  %v3358_v34 = vmax.f32 %v3342_v47, 0.0  ;;  %v5893_v59 = vld [vmem:[%s6033_s6] ss:$0 sm:$0xff] }
 0x2c3   : > { %v3265_v33 = vpop.f32.mrf.mxu1  ;;  %4354 = vmatmul.mubr.msk.f32.gmra.mxu0 %vm1209_vm2, %v3356_v18 }
 0x2c4   : > { %v3357_v56 = vmax.f32 %v3341_v40, 0.0  ;;  %v3320_v41 = vadd.f32 %v3265_v33, %v3080_v29  ;;  %v3344_v35 = vadd.f32 %v5839_v58, %v3321_v55 }
 0x2c5   : > { %v4338_v44 = vpop.f32.mrf.mxu1 }
 0x2c6   : > { %v3343_v12 = vadd.f32 %v5839_v58, %v3320_v41  ;;  %v3323_v38 = vadd.f32 %v4338_v44, %v3095_v9  ;;  %4356 = vmatprep.mubr.msk.f32.mxu0 %vm1209_vm2, %v3357_v56  ;;  %v3360_v52 = vmax.f32 %v3344_v35, 0.0 }
 0x2c7   : > { %v3275_v45 = vpop.f32.mrf.mxu1  ;;  %4357 = vmatmul.mubr.msk.f32.gmra.mxu0 %vm1209_vm2, %v3358_v34 }
 0x2c8   : > { %v3359_v46 = vmax.f32 %v3343_v12, 0.0  ;;  %v3322_v15 = vadd.f32 %v3275_v45, %v3090_v0  ;;  %v3346_v37 = vadd.f32 %v5839_v58, %v3323_v38 }
 0x2c9   : > { %v4341_v62 = vpop.f32.mrf.mxu1 }
 0x2ca   : > { %v3345_v13 = vadd.f32 %v5839_v58, %v3322_v15  ;;  %v3325_v24 = vadd.f32 %v4341_v62, %v3105_v43  ;;  %4359 = vmatprep.mubr.msk.f32.mxu0 %vm1209_vm2, %v3359_v46  ;;  %v3362_v50 = vmax.f32 %v3346_v37, 0.0 }
 0x2cb   : > { %v3285_v21 = vpop.f32.mrf.mxu1  ;;  %4360 = vmatmul.mubr.msk.f32.gmra.mxu0 %vm1209_vm2, %v3360_v52 }
 0x2cc   : > { %v3361_v7 = vmax.f32 %v3345_v13, 0.0  ;;  %v3324_v25 = vadd.f32 %v3285_v21, %v3100_v4  ;;  %v3348_v2 = vadd.f32 %v5839_v58, %v3325_v24 }
 0x2cd   : > { %v4344_v60 = vpop.f32.mrf.mxu1 }
 0x2ce   : > { %v3347_v1 = vadd.f32 %v5839_v58, %v3324_v25  ;;  %v3327_v17 = vadd.f32 %v4344_v60, %v3115_v57  ;;  %4362 = vmatprep.mubr.msk.f32.mxu0 %vm1209_vm2, %v3361_v7  ;;  %v3364_v3 = vmax.f32 %v3348_v2, 0.0 }
 0x2cf   : > { %v3295_v48 = vpop.f32.mrf.mxu1  ;;  %4363 = vmatmul.mubr.msk.f32.gmra.mxu0 %vm1209_vm2, %v3362_v50 }
 0x2d0   : > { %v3363_v11 = vmax.f32 %v3347_v1, 0.0  ;;  %v3326_v20 = vadd.f32 %v3295_v48, %v3110_v30  ;;  %v3350_v31 = vadd.f32 %v5839_v58, %v3327_v17 }
 0x2d1   : > { %v4347_v42 = vpop.f32.mrf.mxu1 }
 0x2d2   : > { %v3349_v10 = vadd.f32 %v5839_v58, %v3326_v20  ;;  %v3329_v23 = vadd.f32 %v4347_v42, %v3125_v16  ;;  %4365 = vmatprep.mubr.msk.f32.mxu0 %vm1209_vm2, %v3363_v11  ;;  %v3366_v19 = vmax.f32 %v3350_v31, 0.0 }
 0x2d3   : > { %v3305_v26 = vpop.f32.mrf.mxu1  ;;  %4366 = vmatmul.mubr.msk.f32.gmra.mxu0 %vm1209_vm2, %v3364_v3 }
 0x2d4   : > { %v3365_v63 = vmax.f32 %v3349_v10, 0.0  ;;  %v3328_v36 = vadd.f32 %v3305_v26, %v3120_v8  ;;  %v3352_v53 = vadd.f32 %v5839_v58, %v3329_v23 }
 0x2d5   : > { %v4378_v6 = vpop.f32.mrf.mxu1 }
 0x2d6   : > { %v3351_v49 = vadd.f32 %v5839_v58, %v3328_v36  ;;  %4368 = vmatprep.mubr.msk.f32.mxu0 %vm1209_vm2, %v3365_v63  ;;  %v3368_v39 = vmax.f32 %v3352_v53, 0.0  ;;  %v5887_v58 = vld [vmem:[%s6035_s8] ss:$0 sm:$0xff] }
 0x2d7   : > { %4369 = vmatmul.mubr.msk.f32.gmra.mxu0 %vm1209_vm2, %v3366_v19  ;;  %v3722_v28 = vpop.f32.mrf.mxu1  ;;  %v3728_v18 = vadd.f32 %v4378_v6, %v5887_v58 }
 0x2d8   : > { %v3367_v5 = vmax.f32 %v3351_v49, 0.0  ;;  %v3723_v33 = vadd.f32 %v5887_v58, %v3722_v28 }
 0x2d9   : > { %v4381_v14 = vpop.f32.mrf.mxu1 }
 0x2da   : > { %4371 = vmatprep.mubr.msk.f32.mxu0 %vm1209_vm2, %v3367_v5  ;;  %v3738_v56 = vadd.f32 %v4381_v14, %v5887_v58 }
 0x2db   : > { %4372 = vmatmul.mubr.msk.f32.gmra.mxu0 %vm1209_vm2, %v3368_v39  ;;  %v3732_v32 = vpop.f32.mrf.mxu1 }
 0x2dc   : > { %v3733_v12 = vadd.f32 %v5887_v58, %v3732_v32 }
 0x2dd   : > { %v4384_v61 = vpop.f32.mrf.mxu1 }
 0x2de   : > { %v3748_v15 = vadd.f32 %v4384_v61, %v5887_v58 }
 0x2df   : > { %v3742_v22 = vpop.f32.mrf.mxu1 }
 0x2e0   : > { %v3743_v24 = vadd.f32 %v5887_v58, %v3742_v22 }
 0x2e1   : > { %v4387_v51 = vpop.f32.mrf.mxu1 }
 0x2e2   : > { %v3758_v50 = vadd.f32 %v4387_v51, %v5887_v58 }
 0x2e3   : > { %v3752_v54 = vpop.f32.mrf.mxu1 }
 0x2e4   : > { %v3753_v48 = vadd.f32 %v5887_v58, %v3752_v54 }
 0x2e5   : > { %v4390_v27 = vpop.f32.mrf.mxu1 }
 0x2e6   : > { %v3768_v31 = vadd.f32 %v4390_v27, %v5887_v58 }
 0x2e7   : > { %v3762_v34 = vpop.f32.mrf.mxu1 }
 0x2e8   : > { %v3763_v63 = vadd.f32 %v5887_v58, %v3762_v34 }
 0x2e9   : > { %v4393_v37 = vpop.f32.mrf.mxu1 }
 0x2ea   : > { %v3778_v5 = vadd.f32 %v4393_v37, %v5887_v58 }
 0x2eb   : > { %v3772_v60 = vpop.f32.mrf.mxu1 }
 0x2ec   : > { %v3773_v61 = vadd.f32 %v5887_v58, %v3772_v60 }
 0x2ed   : > { %v4396_v8 = vpop.f32.mrf.mxu1 }
 0x2ef   : > { %v3782_v6 = vpop.f32.mrf.mxu1 }
 0x37f   : > { %v4352_v47 = vpop.f32.mrf.mxu0 }
 0x380   : > { %v3500_v29 = vadd.f32 %v4352_v47, %v5893_v59  ;;  %v3788_v47 = vadd.f32 %v4396_v8, %v5887_v58 }
 0x381   : > { %v3494_v40 = vpop.f32.mrf.mxu0 }
 0x382   : > { %v3802_v55 = vadd.f32 %v3728_v18, %v3500_v29  ;;  %v3495_v9 = vadd.f32 %v5893_v59, %v3494_v40  ;;  %v4399_v29 = vpop.f32.mrf.mxu1 }
 0x383   : > { %v4355_v41 = vpop.f32.mrf.mxu0 }
 0x384   : > { %v3818_v35 = vmax.f32 %v3802_v55, 0.0  ;;  %v3801_v44 = vadd.f32 %v3723_v33, %v3495_v9  ;;  %v3510_v0 = vadd.f32 %v4355_v41, %v5893_v59  ;;  %v3783_v9 = vadd.f32 %v5887_v58, %v3782_v6 }
 0x385   : > { %v3504_v38 = vpop.f32.mrf.mxu0 }
 0x386   : > { %3835 = vst.msk [vmem:[%s5904_s18 + $0x8] sm:$0xff] %vm3833_vm0, %v3818_v35  ;;  %v3817_v45 = vmax.f32 %v3801_v44, 0.0  ;;  %v3804_v43 = vadd.f32 %v3738_v56, %v3510_v0  ;;  %v3505_v46 = vadd.f32 %v5893_v59, %v3504_v38  ;;  %v3798_v44 = vadd.f32 %v4399_v29, %v5887_v58 }
 0x387   : > { %v4358_v52 = vpop.f32.mrf.mxu0 }
 0x388   : > { %3834 = vst.msk [vmem:[%s5904_s18] sm:$0xff] %vm3833_vm0, %v3817_v45  ;;  %v3820_v62 = vmax.f32 %v3804_v43, 0.0  ;;  %v3803_v4 = vadd.f32 %v3733_v12, %v3505_v46  ;;  %v3520_v13 = vadd.f32 %v4358_v52, %v5893_v59  ;;  %v3792_v12 = vpop.f32.mrf.mxu1 }
 0x389   : > { %v3514_v21 = vpop.f32.mrf.mxu0  ;;  %v3793_v37 = vadd.f32 %v5887_v58, %v3792_v12 }
 0x38a   : > { %3837 = vst.msk [vmem:[%s5904_s18 + $0x18] sm:$0xff] %vm3833_vm0, %v3820_v62  ;;  %v3819_v57 = vmax.f32 %v3803_v4, 0.0  ;;  %v3806_v7 = vadd.f32 %v3748_v15, %v3520_v13  ;;  %v3515_v25 = vadd.f32 %v5893_v59, %v3514_v21 }
 0x38b   : > { %v4361_v2 = vpop.f32.mrf.mxu0 }
 0x38c   : > { %3836 = vst.msk [vmem:[%s5904_s18 + $0x10] sm:$0xff] %vm3833_vm0, %v3819_v57  ;;  %v3822_v30 = vmax.f32 %v3806_v7, 0.0  ;;  %v3805_v1 = vadd.f32 %v3743_v24, %v3515_v25  ;;  %v3530_v17 = vadd.f32 %v4361_v2, %v5893_v59 }
 0x38d   : > { %v3524_v16 = vpop.f32.mrf.mxu0 }
 0x38e   : > { %3839 = vst.msk [vmem:[%s5904_s18 + $0x28] sm:$0xff] %vm3833_vm0, %v3822_v30  ;;  %v3821_v11 = vmax.f32 %v3805_v1, 0.0  ;;  %v3808_v20 = vadd.f32 %v3758_v50, %v3530_v17  ;;  %v3525_v3 = vadd.f32 %v5893_v59, %v3524_v16 }
 0x38f   : > { %v4364_v42 = vpop.f32.mrf.mxu0 }
 0x390   : > { %3838 = vst.msk [vmem:[%s5904_s18 + $0x20] sm:$0xff] %vm3833_vm0, %v3821_v11  ;;  %v3824_v10 = vmax.f32 %v3808_v20, 0.0  ;;  %v3807_v23 = vadd.f32 %v3753_v48, %v3525_v3  ;;  %v3540_v26 = vadd.f32 %v4364_v42, %v5893_v59 }
 0x391   : > { %v3534_v36 = vpop.f32.mrf.mxu0 }
 0x392   : > { %3841 = vst.msk [vmem:[%s5904_s18 + $0x38] sm:$0xff] %vm3833_vm0, %v3824_v10  ;;  %v3823_v19 = vmax.f32 %v3807_v23, 0.0  ;;  %v3810_v53 = vadd.f32 %v3768_v31, %v3540_v26  ;;  %v3535_v49 = vadd.f32 %v5893_v59, %v3534_v36 }
 0x393   : > { %v4367_v39 = vpop.f32.mrf.mxu0 }
 0x394   : > { %3840 = vst.msk [vmem:[%s5904_s18 + $0x30] sm:$0xff] %vm3833_vm0, %v3823_v19  ;;  %v3826_v28 = vmax.f32 %v3810_v53, 0.0  ;;  %v3809_v14 = vadd.f32 %v3763_v63, %v3535_v49  ;;  %v3550_v32 = vadd.f32 %v4367_v39, %v5893_v59 }
 0x395   : > { %v3544_v22 = vpop.f32.mrf.mxu0 }
 0x396   : > { %3843 = vst.msk [vmem:[%s5904_s18 + $0x48] sm:$0xff] %vm3833_vm0, %v3826_v28  ;;  %v3825_v51 = vmax.f32 %v3809_v14, 0.0  ;;  %v3812_v54 = vadd.f32 %v3778_v5, %v3550_v32  ;;  %v3545_v18 = vadd.f32 %v5893_v59, %v3544_v22 }
 0x397   : > { %v4370_v27 = vpop.f32.mrf.mxu0 }
 0x398   : > { %3842 = vst.msk [vmem:[%s5904_s18 + $0x40] sm:$0xff] %vm3833_vm0, %v3825_v51  ;;  %v3828_v40 = vmax.f32 %v3812_v54, 0.0  ;;  %v3811_v55 = vadd.f32 %v3773_v61, %v3545_v18  ;;  %v3560_v33 = vadd.f32 %v4370_v27, %v5893_v59 }
 0x399   : > { %v3554_v56 = vpop.f32.mrf.mxu0 }
 0x39a   : > { %3845 = vst.msk [vmem:[%s5904_s18 + $0x58] sm:$0xff] %vm3833_vm0, %v3828_v40  ;;  %v3827_v41 = vmax.f32 %v3811_v55, 0.0  ;;  %v3814_v34 = vadd.f32 %v3788_v47, %v3560_v33  ;;  %v3555_v35 = vadd.f32 %v5893_v59, %v3554_v56 }
 0x39b   : > { %v4373_v0 = vpop.f32.mrf.mxu0 }
 0x39c   : > { %3844 = vst.msk [vmem:[%s5904_s18 + $0x50] sm:$0xff] %vm3833_vm0, %v3827_v41  ;;  %v3830_v38 = vmax.f32 %v3814_v34, 0.0  ;;  %v3813_v45 = vadd.f32 %v3783_v9, %v3555_v35  ;;  %v3570_v43 = vadd.f32 %v4373_v0, %v5893_v59 }
 0x39d   : > { %v3564_v46 = vpop.f32.mrf.mxu0 }
 0x39e   : > { %3847 = vst.msk [vmem:[%s5904_s18 + $0x68] sm:$0xff] %vm3833_vm0, %v3830_v38  ;;  %v3829_v15 = vmax.f32 %v3813_v45, 0.0  ;;  %v3816_v52 = vadd.f32 %v3798_v44, %v3570_v43  ;;  %v3565_v62 = vadd.f32 %v5893_v59, %v3564_v46 }
 0x3a0   : > { %3846 = vst.msk [vmem:[%s5904_s18 + $0x60] sm:$0xff] %vm3833_vm0, %v3829_v15  ;;  %v3832_v4 = vmax.f32 %v3816_v52, 0.0  ;;  %v3815_v13 = vadd.f32 %v3793_v37, %v3565_v62 }
 0x3a2   : > { %3849 = vst.msk [vmem:[%s5904_s18 + $0x78] sm:$0xff] %vm3833_vm0, %v3832_v4  ;;  %v3831_v24 = vmax.f32 %v3815_v13, 0.0 }
 0x3a4   : > { %3848 = vst.msk [vmem:[%s5904_s18 + $0x70] sm:$0xff] %vm3833_vm0, %v3831_v24 }
 0x3a5   : > { %4543 = shalt.err (!%p4540_p6)
}
 0x3a6   : > { %s4544_s25 = scalar_lea.hbm %s5969_s21, 2048  ;;  %s4548_s17 = scalar_lea.hbm %s6036_s9, 8192 }
 0x3a7   : > { %p4545_p7 = scmp.ne.s32.totalorder %s5969_s21, %s4544_s25  ;;  %p4549_p11 = scmp.lt.s32.totalorder %s5969_s21, %s6036_s9 }
 0x3a8   : > { %p4550_p12 = scmp.lt.s32.totalorder %s4548_s17, %s4544_s25 }
 0x3a9   : > { %p4546_p9 = pnand %p4545_p7, %p4732_p3 }
 0x3aa   : > { %p4551_p13 = por %p4550_p12, %p4549_p11 }
 0x3ab   : > { %p4547_p10 = pneg %p4546_p9 }
 0x3ad   : > { %p4552_p0 = pnand %p4551_p13, %p4547_p10 }
 0x3af   : > { %4555 = shalt.err (!%p4552_p0)
}
 0x3b0   : > { %s4630_s0 = smov 128   ;;  %s6080_s1 = smov 8  }
 0x3b1   : > { %4401 = dma.vmem_to_hbm [thread:$0]  (%p4732_p3), %s5962_s13, 2048, %s5969_s21, %s5975_s24, %s4630_s0, %s4630_s0, %s6080_s1  }
 0x3b2 PF: > { %p4407_p1 = scmp.ge.s32.totalorder %s4622_s16, 2  ;;  %s3882_s12 = sand.u32 1, %s4594_s30  }
 0x3b3   : > { %s3883_s25 = scalar_lea.sflag [#allocation3], %s3882_s12 }
 0x3b4   : > { %p4404_p2 = pnand %p4407_p1, %p4741_p8 }
 0x3b6   : > { %p4405_p4 = pneg %p4404_p2 }
 0x3b8   : > { %4589 = dma.done.wait (%p4405_p4), %s3883_s25, 2048  }
 0x3b9   : > { %4591 = vsyncadd (%p4405_p4), %s3883_s25, 4294965248  ;;  %s22_s16 = sadd.s32 1, %s4622_s16   ;;  %s6081_s30 = smov %s4598_s10 }
 0x3ba   : > { %p19_p5 = scmp.ge.s32.totalorder %s22_s16, 6   ;;  %s6082_s10 = smov %s4602_s11 }
 0x3bb   : > { %s6083_s11 = smov %s4750_s27  ;;  %s6084_s12 = smov %s4614_s14 }
 0x3bc   : > { %s6085_s13 = smov %s4618_s15  ;;  %s6086_s14 = smov %s6089_s19 }
 0x3bd   : > { %s6087_s15 = smov %s6093_s20  ;;  %21 = sbr.rel (!%p19_p5) target bundleno = 8 (0x8), region = 94 }
 0x3c2   :  { %3888 = vsyncpa [#allocation3], 1 }
 0x3c3   :  { %3890 = vsyncpa [#allocation3 + $0x1], 1 }

</bundles_post_ra>
